<compile_context>
chip_gen: v7x
topology: tpu7x:2x2x1
jax: 0.10.0
libtpu: 0.0.40
codegen_flags: <defaults>
</compile_context>

<pallas_src>
import functools

import jax
import jax.numpy as jnp
import numpy as np
from jax.experimental import pallas as pl
from jax.experimental.pallas import tpu as pltpu

EPS = 1e-5  # nn.LayerNorm default eps


def _layernorm(x, gamma, beta):
    mu = jnp.mean(x, axis=-1, keepdims=True)
    var = jnp.mean(jnp.square(x - mu), axis=-1, keepdims=True)
    return (x - mu) * jax.lax.rsqrt(var + EPS) * gamma + beta


def cross_dynamic_conv_kernel(
        x_ref, pin_ref, pout_ref, pre_in_ref, pre_out_ref,
        m1_ref, m2_ref, s1_ref, s2_ref,
        nin_g_ref, nin_b_ref, nout_g_ref, nout_b_ref,
        out_ref, *, K):
    x = x_ref[...]              # (B, HW, Cin)
    pin = pin_ref[...]          # (B, Cin, F)
    pout = pout_ref[...]        # (B, F, Cout)

    nin_g = nin_g_ref[...]      # (1, F)
    nin_b = nin_b_ref[...]
    nout_g = nout_g_ref[...]    # (1, Cout)
    nout_b = nout_b_ref[...]

    def dyn_block(p_in, p_out):
        f = jnp.einsum('bhc,bcf->bhf', x, p_in,
                       preferred_element_type=jnp.float32)
        f = jnp.maximum(_layernorm(f, nin_g, nin_b), 0.0)
        f = jnp.einsum('bhf,bfo->bho', f, p_out,
                       preferred_element_type=jnp.float32)
        f = jnp.maximum(_layernorm(f, nout_g, nout_b), 0.0)
        return f

    feats = dyn_block(pin, pout)          # (B, HW, Cout)

    if K > 0:
        m1 = m1_ref[...]                  # (B, K, F)
        m2 = m2_ref[...]                  # (B, K, Cin)
        s1 = s1_ref[...]                  # (B, K, F)
        s2 = s2_ref[...]                  # (B, K, Cout)
        pre_in = pre_in_ref[...]          # (B, K, Cin, F)
        pre_out = pre_out_ref[...]        # (B, K, F, Cout)

        for idx in range(K):              # K <= 4, static unroll
            m1_k = m1[:, idx, :][:, None, :]      # (B, 1, F)
            m2_k = m2[:, idx, :][:, :, None]      # (B, Cin, 1)
            s1_k = s1[:, idx, :][:, :, None]      # (B, F, 1)
            s2_k = s2[:, idx, :][:, None, :]      # (B, 1, Cout)

            # FMA-form gated filter updates (== m*pre + (1-m)*pin)
            u_in = pin + m1_k * (pre_in[:, idx] - pin)
            u_in = pin + m2_k * (u_in - pin)
            u_out = pout + s1_k * (pre_out[:, idx] - pout)
            u_out = pout + s2_k * (u_out - pout)

            feats = dyn_block(u_in, u_out)

    out_ref[...] = feats.astype(out_ref.dtype)


def cross_dynamic_conv(param_feature, input_feature, dy_filter_list, params,
                       input_feat_shape, stage_idx=0, block_n=8):
    """JAX/Pallas equivalent of CrossDynamicConv.forward."""
    N, Cin = param_feature.shape
    S = input_feat_shape
    H = W = S
    HW = H * W
    F = params['nin_g'].shape[0]
    Cout = params['nout_g'].shape[0]
    K = len(dy_filter_list)
    assert K <= 4, "module caps dy_filter_list at M_score_list_len=4"

    param_feature = param_feature.astype(jnp.float32)
    # NCHW -> (N, HW, Cin)
    x = input_feature.reshape(N, Cin, HW).transpose(0, 2, 1).astype(jnp.float32)

    # ---- plain-JAX glue: dense layers on param_feature ----
    parameters = param_feature @ params['dyn_w'].T + params['dyn_b']
    param_in = parameters[:, :Cin * F].reshape(N, Cin, F)
    param_out = parameters[:, Cin * F:].reshape(N, F, Cout)

    def gate(w, b):
        return jax.nn.sigmoid(param_feature @ w.T + b)

    K_pad = max(K, 1)
    if K > 0:
        # module views the gate linears as (N, dim, 4); keep the K used slices.
        m1 = gate(params['M1_w'], params['M1_b']).reshape(N, F, 4)[..., :K].transpose(0, 2, 1)
        m2 = gate(params['M2_w'], params['M2_b']).reshape(N, Cin, 4)[..., :K].transpose(0, 2, 1)
        s1 = gate(params['S1_w'], params['S1_b']).reshape(N, F, 4)[..., :K].transpose(0, 2, 1)
        s2 = gate(params['S2_w'], params['S2_b']).reshape(N, Cout, 4)[..., :K].transpose(0, 2, 1)
        pre_in = jnp.stack([d[0] for d in dy_filter_list], axis=1).astype(jnp.float32)
        pre_out = jnp.stack([d[1] for d in dy_filter_list], axis=1).astype(jnp.float32)
    else:  # dummy (unused) operands so block shapes stay non-empty
        m1 = jnp.zeros((N, 1, F), jnp.float32)
        m2 = jnp.zeros((N, 1, Cin), jnp.float32)
        s1 = jnp.zeros((N, 1, F), jnp.float32)
        s2 = jnp.zeros((N, 1, Cout), jnp.float32)
        pre_in = jnp.zeros((N, 1, Cin, F), jnp.float32)
        pre_out = jnp.zeros((N, 1, F, Cout), jnp.float32)

    # ---- block proposals per grid step; pad N up to a multiple of B ----
    B = max(1, min(block_n, N))
    n_blocks = -(-N // B)
    N_pad = n_blocks * B

    def padn(a):
        if N_pad == N:
            return a
        return jnp.pad(a, [(0, N_pad - N)] + [(0, 0)] * (a.ndim - 1))

    x_p = padn(x)
    pin_p = padn(param_in)
    pout_p = padn(param_out)
    pre_in_p = padn(pre_in)
    pre_out_p = padn(pre_out)
    m1_p = padn(m1); m2_p = padn(m2); s1_p = padn(s1); s2_p = padn(s2)

    nin_g = params['nin_g'][None, :].astype(jnp.float32)
    nin_b = params['nin_b'][None, :].astype(jnp.float32)
    nout_g = params['nout_g'][None, :].astype(jnp.float32)
    nout_b = params['nout_b'][None, :].astype(jnp.float32)

    kernel = functools.partial(cross_dynamic_conv_kernel, K=K)

    def per_n(tail):
        nd = len(tail)
        return pl.BlockSpec((B,) + tail, lambda i, _nd=nd: (i,) + (0,) * _nd)

    def shared(shape):
        nd = len(shape)
        return pl.BlockSpec(shape, lambda i, _nd=nd: (0,) * _nd)

    feats3 = pl.pallas_call(
        kernel,
        out_shape=jax.ShapeDtypeStruct((N_pad, HW, Cout), jnp.float32),
        grid_spec=pltpu.PrefetchScalarGridSpec(
            num_scalar_prefetch=0,
            grid=(n_blocks,),
            in_specs=[
                per_n((HW, Cin)),           # x
                per_n((Cin, F)),            # param_in
                per_n((F, Cout)),           # param_out
                per_n((K_pad, Cin, F)),     # stacked pre_param_in
                per_n((K_pad, F, Cout)),    # stacked pre_param_out
                per_n((K_pad, F)),          # M1 gates
                per_n((K_pad, Cin)),        # M2 gates
                per_n((K_pad, F)),          # S1 gates
                per_n((K_pad, Cout)),       # S2 gates
                shared((1, F)), shared((1, F)),         # norm_in gamma/beta
                shared((1, Cout)), shared((1, Cout)),   # norm_out gamma/beta
            ],
            out_specs=per_n((HW, Cout)),
        ),
        compiler_params=pltpu.CompilerParams(
            dimension_semantics=("parallel",),
            vmem_limit_bytes=32 * 1024 * 1024),
    )(x_p, pin_p, pout_p, pre_in_p, pre_out_p, m1_p, m2_p, s1_p, s2_p,
      nin_g, nin_b, nout_g, nout_b)

    feats3 = feats3[:N]                          # (N, HW, Cout)

    # ---- final flatten + fc + LayerNorm + ReLU: one big XLA matmul ----
    flat = feats3.reshape(N, HW * Cout)
    y = flat @ params['fc_w'].T + params['fc_b']
    mu = jnp.mean(y, axis=-1, keepdims=True)
    var = jnp.mean(jnp.square(y - mu), axis=-1, keepdims=True)
    y = (y - mu) * jax.lax.rsqrt(var + EPS) * params['fcn_g'] + params['fcn_b']
    y = jnp.maximum(y, 0.0)

    if stage_idx == 1:
        dy_filter_list = []
    new_list = list(dy_filter_list) + [(param_in, param_out)]
    return y, new_list


# ---------------- pure-JAX reference (mirrors the PyTorch code) ----------------
def reference_forward(param_feature, input_feature, dy_filter_list, params, S):
    N, Cin = param_feature.shape
    H = W = S
    HW = H * W
    F = params['nin_g'].shape[0]
    Cout = params['nout_g'].shape[0]
    inp = input_feature.reshape(N, Cin, HW).transpose(0, 2, 1)

    parameters = param_feature @ params['dyn_w'].T + params['dyn_b']
    p_in = parameters[:, :Cin * F].reshape(N, Cin, F)
    p_out = parameters[:, Cin * F:].reshape(N, F, Cout)

    def ln(z, g, b):
        mu = z.mean(-1, keepdims=True)
        var = ((z - mu) ** 2).mean(-1, keepdims=True)
        return (z - mu) / jnp.sqrt(var + EPS) * g + b

    def dyn(pi, po):
        f = jnp.einsum('nhc,ncf->nhf', inp, pi)
        f = jax.nn.relu(ln(f, params['nin_g'], params['nin_b']))
        f = jnp.einsum('nhf,nfo->nho', f, po)
        f = jax.nn.relu(ln(f, params['nout_g'], params['nout_b']))
        return f

    feats = dyn(p_in, p_out)
    ori = inp
    sig = jax.nn.sigmoid
    M1 = sig(param_feature @ params['M1_w'].T + params['M1_b']).reshape(N, 1, F, 4)
    M2 = sig(param_feature @ params['M2_w'].T + params['M2_b']).reshape(N, Cin, 1, 4)
    S1 = sig(param_feature @ params['S1_w'].T + params['S1_b']).reshape(N, F, 1, 4)
    S2 = sig(param_feature @ params['S2_w'].T + params['S2_b']).reshape(N, 1, Cout, 4)
    for idx, (pre_i, pre_o) in enumerate(dy_filter_list):
        u_in = M1[..., idx] * pre_i + (1 - M1[..., idx]) * p_in
        u_in = M2[..., idx] * u_in + (1 - M2[..., idx]) * p_in
        u_out = S1[..., idx] * pre_o + (1 - S1[..., idx]) * p_out
        u_out = S2[..., idx] * u_out + (1 - S2[..., idx]) * p_out
        # subbox block kept verbatim from the module (dead w.r.t. outputs)
        f4 = feats.reshape(N, H, W, Cout)
        fw = f4.reshape(N, H, W * Cout) @ params['sw_w'].T + params['sw_b']
        fw = fw.reshape(N, HW, Cout)
        fh = jnp.transpose(f4, (0, 2, 1, 3)).reshape(N, W, H * Cout) \
            @ params['sh_w'].T + params['sh_b']
        fh = jnp.transpose(fh.reshape(N, W, H, Cout), (0, 2, 1, 3)).reshape(N, HW, Cout)
        ori = fw + fh + ori
        feats = dyn(u_in, u_out)
    flat = feats.reshape(N, HW * Cout)
    y = flat @ params['fc_w'].T + params['fc_b']
    y = jax.nn.relu(ln(y, params['fcn_g'], params['fcn_b']))
    return y


def make_params(key, Cin, F, Cout, S):
    HW = S * S
    ks = jax.random.split(key, 22)

    def w(k, shape, fan_in):
        return jax.random.normal(k, shape, jnp.float32) / np.sqrt(fan_in)

    p = {}
    p['dyn_w'] = w(ks[0], (Cin * F + F * Cout, Cin), Cin)
    p['dyn_b'] = w(ks[1], (Cin * F + F * Cout,), Cin)
    p['nin_g'] = 1.0 + 0.1 * jax.random.normal(ks[2], (F,), jnp.float32)
    p['nin_b'] = 0.1 * jax.random.normal(ks[3], (F,), jnp.float32)
    p['nout_g'] = 1.0 + 0.1 * jax.random.normal(ks[4], (Cout,), jnp.float32)
    p['nout_b'] = 0.1 * jax.random.normal(ks[5], (Cout,), jnp.float32)
    p['M1_w'] = w(ks[6], (F * 4, Cin), Cin);     p['M1_b'] = w(ks[7], (F * 4,), Cin)
    p['M2_w'] = w(ks[8], (Cin * 4, Cin), Cin);   p['M2_b'] = w(ks[9], (Cin * 4,), Cin)
    p['S1_w'] = w(ks[10], (F * 4, Cin), Cin);    p['S1_b'] = w(ks[11], (F * 4,), Cin)
    p['S2_w'] = w(ks[12], (Cout * 4, Cin), Cin); p['S2_b'] = w(ks[13], (Cout * 4,), Cin)
    p['sw_w'] = w(ks[14], (S * Cout, S * Cout), S * Cout)
    p['sw_b'] = w(ks[15], (S * Cout,), S * Cout)
    p['sh_w'] = w(ks[16], (S * Cout, S * Cout), S * Cout)
    p['sh_b'] = w(ks[17], (S * Cout,), S * Cout)
    p['fc_w'] = w(ks[18], (Cout, HW * Cout), HW * Cout)
    p['fc_b'] = w(ks[19], (Cout,), HW * Cout)
    p['fcn_g'] = 1.0 + 0.1 * jax.random.normal(ks[20], (Cout,), jnp.float32)
    p['fcn_b'] = 0.1 * jax.random.normal(ks[21], (Cout,), jnp.float32)
    return p


if __name__ == "__main__":
    # small, module-consistent shapes: in_channels=32, feat_channels=16,
    # out_channels=in_channels, input_feat_shape=4, num_proposals=10,
    # len(dy_filter_list)=2 (<= M_score_list_len=4); block_n=8 exercises
    # both the proposal-blocking and the N-padding paths.
    N, Cin, F, S = 10, 32, 16, 4
    Cout = Cin
    K = 2

    key = jax.random.PRNGKey(0)
    kparam, kinp, kpre, kw = jax.random.split(key, 4)
    params = make_params(kw, Cin, F, Cout, S)

    param_feature = jax.random.normal(kparam, (N, Cin), jnp.float32)
    input_feature = jax.random.normal(kinp, (N, Cin, S, S), jnp.float32)  # NCHW
    pk = jax.random.split(kpre, 2 * K)
    dy_filter_list = [
        (0.1 * jax.random.normal(pk[2 * i], (N, Cin, F), jnp.float32),
         0.1 * jax.random.normal(pk[2 * i + 1], (N, F, Cout), jnp.float32))
        for i in range(K)
    ]

    feats, new_list = cross_dynamic_conv(param_feature, input_feature,
                                         dy_filter_list, params, S,
                                         stage_idx=0, block_n=8)
    feats = jax.block_until_ready(feats)

    ref = jax.block_until_ready(
        reference_forward(param_feature, input_feature, dy_filter_list, params, S))

    assert feats.shape == (N, Cout)
    assert len(new_list) == K + 1
    np.testing.assert_allclose(np.asarray(feats), np.asarray(ref),
                               rtol=2e-3, atol=2e-3)
    print("KERNEL_OK")
</pallas_src>

<mosaic_0001>
module attributes {stable_mosaic.version = 11 : i64} {
  func.func @cross_dynamic_conv_kernel(%arg0: i32, %arg1: memref<8x16x32xf32, #tpu.memory_space<vmem>>, %arg2: memref<8x32x16xf32, #tpu.memory_space<vmem>>, %arg3: memref<8x16x32xf32, #tpu.memory_space<vmem>>, %arg4: memref<8x2x32x16xf32, #tpu.memory_space<vmem>>, %arg5: memref<8x2x16x32xf32, #tpu.memory_space<vmem>>, %arg6: memref<8x2x16xf32, #tpu.memory_space<vmem>>, %arg7: memref<8x2x32xf32, #tpu.memory_space<vmem>>, %arg8: memref<8x2x16xf32, #tpu.memory_space<vmem>>, %arg9: memref<8x2x32xf32, #tpu.memory_space<vmem>>, %arg10: memref<1x16xf32, #tpu.memory_space<vmem>>, %arg11: memref<1x16xf32, #tpu.memory_space<vmem>>, %arg12: memref<1x32xf32, #tpu.memory_space<vmem>>, %arg13: memref<1x32xf32, #tpu.memory_space<vmem>>, %arg14: memref<8x16x32xf32, #tpu.memory_space<vmem>>) attributes {dimension_semantics = [#tpu.dimension_semantics<parallel>], iteration_bounds = array<i64: 2>, scalar_prefetch = 0 : i64, scratch_operands = 0 : i64, tpu.core_type = #tpu.core_type<tc>, window_params = [{transform_indices = @transform_0, window_bounds = array<i64: 8, 16, 32>}, {transform_indices = @transform_1, window_bounds = array<i64: 8, 32, 16>}, {transform_indices = @transform_2, window_bounds = array<i64: 8, 16, 32>}, {transform_indices = @transform_3, window_bounds = array<i64: 8, 2, 32, 16>}, {transform_indices = @transform_4, window_bounds = array<i64: 8, 2, 16, 32>}, {transform_indices = @transform_5, window_bounds = array<i64: 8, 2, 16>}, {transform_indices = @transform_6, window_bounds = array<i64: 8, 2, 32>}, {transform_indices = @transform_7, window_bounds = array<i64: 8, 2, 16>}, {transform_indices = @transform_8, window_bounds = array<i64: 8, 2, 32>}, {pipeline_mode = #tpu.pipeline_mode<synchronous>, transform_indices = @transform_9, window_bounds = array<i64: 1, 16>}, {pipeline_mode = #tpu.pipeline_mode<synchronous>, transform_indices = @transform_10, window_bounds = array<i64: 1, 16>}, {pipeline_mode = #tpu.pipeline_mode<synchronous>, transform_indices = @transform_11, window_bounds = array<i64: 1, 32>}, {pipeline_mode = #tpu.pipeline_mode<synchronous>, transform_indices = @transform_12, window_bounds = array<i64: 1, 32>}, {transform_indices = @transform_13, window_bounds = array<i64: 8, 16, 32>}]} {
    %c0 = arith.constant 0 : index
    %c0_0 = arith.constant 0 : index
    %c0_1 = arith.constant 0 : index
    %0 = vector.load %arg1[%c0, %c0_0, %c0_1] : memref<8x16x32xf32, #tpu.memory_space<vmem>>, vector<8x16x32xf32>
    %c0_2 = arith.constant 0 : index
    %c0_3 = arith.constant 0 : index
    %c0_4 = arith.constant 0 : index
    %1 = vector.load %arg2[%c0_2, %c0_3, %c0_4] : memref<8x32x16xf32, #tpu.memory_space<vmem>>, vector<8x32x16xf32>
    %c0_5 = arith.constant 0 : index
    %c0_6 = arith.constant 0 : index
    %c0_7 = arith.constant 0 : index
    %2 = vector.load %arg3[%c0_5, %c0_6, %c0_7] : memref<8x16x32xf32, #tpu.memory_space<vmem>>, vector<8x16x32xf32>
    %c0_8 = arith.constant 0 : index
    %c0_9 = arith.constant 0 : index
    %3 = vector.load %arg10[%c0_8, %c0_9] : memref<1x16xf32, #tpu.memory_space<vmem>>, vector<1x16xf32>
    %c0_10 = arith.constant 0 : index
    %c0_11 = arith.constant 0 : index
    %4 = vector.load %arg11[%c0_10, %c0_11] : memref<1x16xf32, #tpu.memory_space<vmem>>, vector<1x16xf32>
    %c0_12 = arith.constant 0 : index
    %c0_13 = arith.constant 0 : index
    %5 = vector.load %arg12[%c0_12, %c0_13] : memref<1x32xf32, #tpu.memory_space<vmem>>, vector<1x32xf32>
    %c0_14 = arith.constant 0 : index
    %c0_15 = arith.constant 0 : index
    %6 = vector.load %arg13[%c0_14, %c0_15] : memref<1x32xf32, #tpu.memory_space<vmem>>, vector<1x32xf32>
    %c0_16 = arith.constant 0 : index
    %c0_17 = arith.constant 0 : index
    %c0_18 = arith.constant 0 : index
    %7 = vector.load %arg6[%c0_16, %c0_17, %c0_18] : memref<8x2x16xf32, #tpu.memory_space<vmem>>, vector<8x2x16xf32>
    %c0_19 = arith.constant 0 : index
    %c0_20 = arith.constant 0 : index
    %c0_21 = arith.constant 0 : index
    %8 = vector.load %arg7[%c0_19, %c0_20, %c0_21] : memref<8x2x32xf32, #tpu.memory_space<vmem>>, vector<8x2x32xf32>
    %c0_22 = arith.constant 0 : index
    %c0_23 = arith.constant 0 : index
    %c0_24 = arith.constant 0 : index
    %9 = vector.load %arg8[%c0_22, %c0_23, %c0_24] : memref<8x2x16xf32, #tpu.memory_space<vmem>>, vector<8x2x16xf32>
    %c0_25 = arith.constant 0 : index
    %c0_26 = arith.constant 0 : index
    %c0_27 = arith.constant 0 : index
    %10 = vector.load %arg9[%c0_25, %c0_26, %c0_27] : memref<8x2x32xf32, #tpu.memory_space<vmem>>, vector<8x2x32xf32>
    %c0_28 = arith.constant 0 : index
    %c0_29 = arith.constant 0 : index
    %c0_30 = arith.constant 0 : index
    %c0_31 = arith.constant 0 : index
    %11 = vector.load %arg4[%c0_28, %c0_29, %c0_30, %c0_31] : memref<8x2x32x16xf32, #tpu.memory_space<vmem>>, vector<8x2x32x16xf32>
    %c0_32 = arith.constant 0 : index
    %c0_33 = arith.constant 0 : index
    %c0_34 = arith.constant 0 : index
    %c0_35 = arith.constant 0 : index
    %12 = vector.load %arg5[%c0_32, %c0_33, %c0_34, %c0_35] : memref<8x2x16x32xf32, #tpu.memory_space<vmem>>, vector<8x2x16x32xf32>
    %13 = vector.extract_strided_slice %7 {offsets = [0, 1, 0], sizes = [8, 1, 16], strides = [1, 1, 1]} : vector<8x2x16xf32> to vector<8x1x16xf32>
    %14 = vector.shape_cast %13 : vector<8x1x16xf32> to vector<8x16xf32>
    %15 = vector.shape_cast %14 : vector<8x16xf32> to vector<8x1x16xf32>
    %16 = vector.extract_strided_slice %8 {offsets = [0, 1, 0], sizes = [8, 1, 32], strides = [1, 1, 1]} : vector<8x2x32xf32> to vector<8x1x32xf32>
    %17 = vector.shape_cast %16 : vector<8x1x32xf32> to vector<8x32xf32>
    %18 = vector.shape_cast %17 : vector<8x32xf32> to vector<8x32x1xf32>
    %19 = vector.extract_strided_slice %9 {offsets = [0, 1, 0], sizes = [8, 1, 16], strides = [1, 1, 1]} : vector<8x2x16xf32> to vector<8x1x16xf32>
    %20 = vector.shape_cast %19 : vector<8x1x16xf32> to vector<8x16xf32>
    %21 = vector.shape_cast %20 : vector<8x16xf32> to vector<8x16x1xf32>
    %22 = vector.extract_strided_slice %10 {offsets = [0, 1, 0], sizes = [8, 1, 32], strides = [1, 1, 1]} : vector<8x2x32xf32> to vector<8x1x32xf32>
    %23 = vector.shape_cast %22 : vector<8x1x32xf32> to vector<8x32xf32>
    %24 = vector.shape_cast %23 : vector<8x32xf32> to vector<8x1x32xf32>
    %25 = vector.extract_strided_slice %11 {offsets = [0, 1, 0, 0], sizes = [8, 1, 32, 16], strides = [1, 1, 1, 1]} : vector<8x2x32x16xf32> to vector<8x1x32x16xf32>
    %26 = vector.shape_cast %25 : vector<8x1x32x16xf32> to vector<8x32x16xf32>
    %27 = arith.subf %26, %1 : vector<8x32x16xf32>
    %28 = vector.broadcast %15 : vector<8x1x16xf32> to vector<8x32x16xf32>
    %29 = arith.mulf %28, %27 : vector<8x32x16xf32>
    %30 = arith.addf %1, %29 : vector<8x32x16xf32>
    %31 = arith.subf %30, %1 : vector<8x32x16xf32>
    %32 = vector.broadcast %18 : vector<8x32x1xf32> to vector<8x32x16xf32>
    %33 = arith.mulf %32, %31 : vector<8x32x16xf32>
    %34 = arith.addf %1, %33 : vector<8x32x16xf32>
    %35 = vector.extract_strided_slice %12 {offsets = [0, 1, 0, 0], sizes = [8, 1, 16, 32], strides = [1, 1, 1, 1]} : vector<8x2x16x32xf32> to vector<8x1x16x32xf32>
    %36 = vector.shape_cast %35 : vector<8x1x16x32xf32> to vector<8x16x32xf32>
    %37 = arith.subf %36, %2 : vector<8x16x32xf32>
    %38 = vector.broadcast %21 : vector<8x16x1xf32> to vector<8x16x32xf32>
    %39 = arith.mulf %38, %37 : vector<8x16x32xf32>
    %40 = arith.addf %2, %39 : vector<8x16x32xf32>
    %41 = arith.subf %40, %2 : vector<8x16x32xf32>
    %42 = vector.broadcast %24 : vector<8x1x32xf32> to vector<8x16x32xf32>
    %43 = arith.mulf %42, %41 : vector<8x16x32xf32>
    %44 = arith.addf %2, %43 : vector<8x16x32xf32>
    "tpu.trace_start"() <{level = 10 : i32, message = "bhc,bcf->bhf"}> : () -> ()
    %cst = arith.constant dense<0.000000e+00> : vector<8x16x16xf32>
    %45 = tpu.matmul %0, %34, %cst {dimension_numbers = #tpu.dot_dimension_numbers<[2], [1], [1], [2], [0, 0, 0, 1, 1, 2], [0], [0]>} : vector<8x16x32xf32>, vector<8x32x16xf32>, vector<8x16x16xf32> -> vector<8x16x16xf32>
    "tpu.trace_stop"() : () -> ()
    %cst_36 = arith.constant dense<0.000000e+00> : vector<8x16xf32>
    %46 = vector.multi_reduction <add>, %45, %cst_36 [2] : vector<8x16x16xf32> to vector<8x16xf32>
    %47 = vector.shape_cast %46 : vector<8x16xf32> to vector<8x16x1xf32>
    %cst_37 = arith.constant 1.600000e+01 : f32
    %48 = vector.broadcast %cst_37 : f32 to vector<8x16x1xf32>
    %49 = arith.divf %47, %48 : vector<8x16x1xf32>
    %50 = vector.broadcast %49 : vector<8x16x1xf32> to vector<8x16x16xf32>
    %51 = arith.subf %45, %50 : vector<8x16x16xf32>
    %52 = arith.mulf %51, %51 : vector<8x16x16xf32>
    %cst_38 = arith.constant dense<0.000000e+00> : vector<8x16xf32>
    %53 = vector.multi_reduction <add>, %52, %cst_38 [2] : vector<8x16x16xf32> to vector<8x16xf32>
    %54 = vector.shape_cast %53 : vector<8x16xf32> to vector<8x16x1xf32>
    %cst_39 = arith.constant 1.600000e+01 : f32
    %55 = vector.broadcast %cst_39 : f32 to vector<8x16x1xf32>
    %56 = arith.divf %54, %55 : vector<8x16x1xf32>
    %57 = vector.broadcast %49 : vector<8x16x1xf32> to vector<8x16x16xf32>
    %58 = arith.subf %45, %57 : vector<8x16x16xf32>
    %cst_40 = arith.constant 9.99999974E-6 : f32
    %59 = vector.broadcast %cst_40 : f32 to vector<8x16x1xf32>
    %60 = arith.addf %56, %59 : vector<8x16x1xf32>
    %61 = math.rsqrt %60 : vector<8x16x1xf32>
    %62 = vector.broadcast %61 : vector<8x16x1xf32> to vector<8x16x16xf32>
    %63 = arith.mulf %58, %62 : vector<8x16x16xf32>
    %64 = vector.shape_cast %3 : vector<1x16xf32> to vector<1x1x16xf32>
    %65 = vector.broadcast %64 : vector<1x1x16xf32> to vector<8x16x16xf32>
    %66 = arith.mulf %63, %65 : vector<8x16x16xf32>
    %67 = vector.shape_cast %4 : vector<1x16xf32> to vector<1x1x16xf32>
    %68 = vector.broadcast %67 : vector<1x1x16xf32> to vector<8x16x16xf32>
    %69 = arith.addf %66, %68 : vector<8x16x16xf32>
    %cst_41 = arith.constant 0.000000e+00 : f32
    %70 = vector.broadcast %cst_41 : f32 to vector<8x16x16xf32>
    %71 = arith.maximumf %69, %70 : vector<8x16x16xf32>
    "tpu.trace_start"() <{level = 10 : i32, message = "bhf,bfo->bho"}> : () -> ()
    %cst_42 = arith.constant dense<0.000000e+00> : vector<8x16x32xf32>
    %72 = tpu.matmul %71, %44, %cst_42 {dimension_numbers = #tpu.dot_dimension_numbers<[2], [1], [1], [2], [0, 0, 0, 1, 1, 2], [0], [0]>} : vector<8x16x16xf32>, vector<8x16x32xf32>, vector<8x16x32xf32> -> vector<8x16x32xf32>
    "tpu.trace_stop"() : () -> ()
    %cst_43 = arith.constant dense<0.000000e+00> : vector<8x16xf32>
    %73 = vector.multi_reduction <add>, %72, %cst_43 [2] : vector<8x16x32xf32> to vector<8x16xf32>
    %74 = vector.shape_cast %73 : vector<8x16xf32> to vector<8x16x1xf32>
    %cst_44 = arith.constant 3.200000e+01 : f32
    %75 = vector.broadcast %cst_44 : f32 to vector<8x16x1xf32>
    %76 = arith.divf %74, %75 : vector<8x16x1xf32>
    %77 = vector.broadcast %76 : vector<8x16x1xf32> to vector<8x16x32xf32>
    %78 = arith.subf %72, %77 : vector<8x16x32xf32>
    %79 = arith.mulf %78, %78 : vector<8x16x32xf32>
    %cst_45 = arith.constant dense<0.000000e+00> : vector<8x16xf32>
    %80 = vector.multi_reduction <add>, %79, %cst_45 [2] : vector<8x16x32xf32> to vector<8x16xf32>
    %81 = vector.shape_cast %80 : vector<8x16xf32> to vector<8x16x1xf32>
    %cst_46 = arith.constant 3.200000e+01 : f32
    %82 = vector.broadcast %cst_46 : f32 to vector<8x16x1xf32>
    %83 = arith.divf %81, %82 : vector<8x16x1xf32>
    %84 = vector.broadcast %76 : vector<8x16x1xf32> to vector<8x16x32xf32>
    %85 = arith.subf %72, %84 : vector<8x16x32xf32>
    %cst_47 = arith.constant 9.99999974E-6 : f32
    %86 = vector.broadcast %cst_47 : f32 to vector<8x16x1xf32>
    %87 = arith.addf %83, %86 : vector<8x16x1xf32>
    %88 = math.rsqrt %87 : vector<8x16x1xf32>
    %89 = vector.broadcast %88 : vector<8x16x1xf32> to vector<8x16x32xf32>
    %90 = arith.mulf %85, %89 : vector<8x16x32xf32>
    %91 = vector.shape_cast %5 : vector<1x32xf32> to vector<1x1x32xf32>
    %92 = vector.broadcast %91 : vector<1x1x32xf32> to vector<8x16x32xf32>
    %93 = arith.mulf %90, %92 : vector<8x16x32xf32>
    %94 = vector.shape_cast %6 : vector<1x32xf32> to vector<1x1x32xf32>
    %95 = vector.broadcast %94 : vector<1x1x32xf32> to vector<8x16x32xf32>
    %96 = arith.addf %93, %95 : vector<8x16x32xf32>
    %cst_48 = arith.constant 0.000000e+00 : f32
    %97 = vector.broadcast %cst_48 : f32 to vector<8x16x32xf32>
    %98 = arith.maximumf %96, %97 : vector<8x16x32xf32>
    %c0_49 = arith.constant 0 : index
    %c0_50 = arith.constant 0 : index
    %c0_51 = arith.constant 0 : index
    %99 = vector.load %arg14[%c0_49, %c0_50, %c0_51] : memref<8x16x32xf32, #tpu.memory_space<vmem>>, vector<8x16x32xf32>
    tpu.vector_store %arg14[%c0_49, %c0_50, %c0_51], %98 {strides = array<i32>} : memref<8x16x32xf32, #tpu.memory_space<vmem>>, vector<8x16x32xf32>,
    return
  }
  func.func @transform_0(%arg0: i32) -> (i32, i32, i32) {
    %c0_i32 = arith.constant 0 : i32
    %c0_i32_0 = arith.constant 0 : i32
    %c0_i32_1 = arith.constant 0 : i32
    return %arg0, %c0_i32, %c0_i32_0 : i32, i32, i32
  }
  func.func @transform_1(%arg0: i32) -> (i32, i32, i32) {
    %c0_i32 = arith.constant 0 : i32
    %c0_i32_0 = arith.constant 0 : i32
    %c0_i32_1 = arith.constant 0 : i32
    return %arg0, %c0_i32, %c0_i32_0 : i32, i32, i32
  }
  func.func @transform_2(%arg0: i32) -> (i32, i32, i32) {
    %c0_i32 = arith.constant 0 : i32
    %c0_i32_0 = arith.constant 0 : i32
    %c0_i32_1 = arith.constant 0 : i32
    return %arg0, %c0_i32, %c0_i32_0 : i32, i32, i32
  }
  func.func @transform_3(%arg0: i32) -> (i32, i32, i32, i32) {
    %c0_i32 = arith.constant 0 : i32
    %c0_i32_0 = arith.constant 0 : i32
    %c0_i32_1 = arith.constant 0 : i32
    %c0_i32_2 = arith.constant 0 : i32
    return %arg0, %c0_i32, %c0_i32_0, %c0_i32_1 : i32, i32, i32, i32
  }
  func.func @transform_4(%arg0: i32) -> (i32, i32, i32, i32) {
    %c0_i32 = arith.constant 0 : i32
    %c0_i32_0 = arith.constant 0 : i32
    %c0_i32_1 = arith.constant 0 : i32
    %c0_i32_2 = arith.constant 0 : i32
    return %arg0, %c0_i32, %c0_i32_0, %c0_i32_1 : i32, i32, i32, i32
  }
  func.func @transform_5(%arg0: i32) -> (i32, i32, i32) {
    %c0_i32 = arith.constant 0 : i32
    %c0_i32_0 = arith.constant 0 : i32
    %c0_i32_1 = arith.constant 0 : i32
    return %arg0, %c0_i32, %c0_i32_0 : i32, i32, i32
  }
  func.func @transform_6(%arg0: i32) -> (i32, i32, i32) {
    %c0_i32 = arith.constant 0 : i32
    %c0_i32_0 = arith.constant 0 : i32
    %c0_i32_1 = arith.constant 0 : i32
    return %arg0, %c0_i32, %c0_i32_0 : i32, i32, i32
  }
  func.func @transform_7(%arg0: i32) -> (i32, i32, i32) {
    %c0_i32 = arith.constant 0 : i32
    %c0_i32_0 = arith.constant 0 : i32
    %c0_i32_1 = arith.constant 0 : i32
    return %arg0, %c0_i32, %c0_i32_0 : i32, i32, i32
  }
  func.func @transform_8(%arg0: i32) -> (i32, i32, i32) {
    %c0_i32 = arith.constant 0 : i32
    %c0_i32_0 = arith.constant 0 : i32
    %c0_i32_1 = arith.constant 0 : i32
    return %arg0, %c0_i32, %c0_i32_0 : i32, i32, i32
  }
  func.func @transform_9(%arg0: i32) -> (i32, i32) {
    %c0_i32 = arith.constant 0 : i32
    %c0_i32_0 = arith.constant 0 : i32
    %c0_i32_1 = arith.constant 0 : i32
    return %c0_i32, %c0_i32_0 : i32, i32
  }
  func.func @transform_10(%arg0: i32) -> (i32, i32) {
    %c0_i32 = arith.constant 0 : i32
    %c0_i32_0 = arith.constant 0 : i32
    %c0_i32_1 = arith.constant 0 : i32
    return %c0_i32, %c0_i32_0 : i32, i32
  }
  func.func @transform_11(%arg0: i32) -> (i32, i32) {
    %c0_i32 = arith.constant 0 : i32
    %c0_i32_0 = arith.constant 0 : i32
    %c0_i32_1 = arith.constant 0 : i32
    return %c0_i32, %c0_i32_0 : i32, i32
  }
  func.func @transform_12(%arg0: i32) -> (i32, i32) {
    %c0_i32 = arith.constant 0 : i32
    %c0_i32_0 = arith.constant 0 : i32
    %c0_i32_1 = arith.constant 0 : i32
    return %c0_i32, %c0_i32_0 : i32, i32
  }
  func.func @transform_13(%arg0: i32) -> (i32, i32, i32) {
    %c0_i32 = arith.constant 0 : i32
    %c0_i32_0 = arith.constant 0 : i32
    %c0_i32_1 = arith.constant 0 : i32
    return %arg0, %c0_i32, %c0_i32_0 : i32, i32, i32
  }
}

</mosaic_0001>

<bundles_post_ra>
// kernel: tpu_custom_call.1
= control target key start
LH: loop header
LB: loop body
LE: loop exit
PB: predicated region body
PF: predicated region fallthrough
CT: control target
= control target key end

     0   :  { %s5149_s0 = inlined_call_operand.vmem [shape: f32[16,16,32], index: 0, kind: input, shape index: {}]   ;;  %s5150_s1 = inlined_call_operand.vmem [shape: f32[16,32,16], index: 1, kind: input, shape index: {}]   ;;  %s5151_s2 = inlined_call_operand.vmem [shape: f32[16,16,32], index: 2, kind: input, shape index: {}]   ;;  %s5152_s3 = inlined_call_operand.vmem [shape: f32[16,2,32,16], index: 3, kind: input, shape index: {}]   ;;  %s5153_s4 = inlined_call_operand.vmem [shape: f32[16,2,16,32], index: 4, kind: input, shape index: {}]   ;;  %s5154_s5 = inlined_call_operand.vmem [shape: f32[16,2,16], index: 5, kind: input, shape index: {}]   ;;  %s5155_s6 = inlined_call_operand.vmem [shape: f32[16,2,32], index: 6, kind: input, shape index: {}]   ;;  %s5156_s7 = inlined_call_operand.vmem [shape: f32[16,2,16], index: 7, kind: input, shape index: {}]   ;;  %s5157_s8 = inlined_call_operand.vmem [shape: f32[16,2,32], index: 8, kind: input, shape index: {}]   ;;  %s5158_s9 = inlined_call_operand.vmem [shape: f32[1,16], index: 9, kind: input, shape index: {}]   ;;  %s5159_s10 = inlined_call_operand.vmem [shape: f32[1,16], index: 10, kind: input, shape index: {}]   ;;  %s5160_s11 = inlined_call_operand.vmem [shape: f32[1,32], index: 11, kind: input, shape index: {}]   ;;  %s5161_s12 = inlined_call_operand.vmem [shape: f32[1,32], index: 12, kind: input, shape index: {}]   ;;  %s5162_s13 = inlined_call_operand.hbm [shape: f32[16,16,32], index: 13, kind: output, shape index: {}]  }
   0x1   :  { %5168 = sst [smem:[#allocation9_spill]] %s5149_s0 }
   0x2   :  { %5169 = sst [smem:[#allocation10_spill]] %s5155_s6 }
   0x3   :  { %5170 = sst [smem:[#allocation11_spill]] %s5156_s7 }
   0x4   :  { %18 = vsyncpa [#allocation3], 0 }
   0x5   :  { %20 = vsyncpa [#allocation3 + $0x1], 0  ;;  %s4037_s25 = smov 0   ;;  %s4039_s26 = smov 0  }
   0x6   :  { %s4041_s27 = smov 0   ;;  %s4043_s28 = smov 0  }
   0x7 LB: > { %5171 = sst [smem:[#allocation5_spill]] %s3958_s27  ;;  %s4058_s29 = sadd.s32 4294967295, %s3962_s28   ;;  %s3962_s28 = sphi %s4043_s28, %s5182_s28   ;;  %s3958_s27 = sphi %s4041_s27, %s5184_s27   ;;  %s3954_s26 = sphi %s4039_s26, %s5186_s26   ;;  %s3950_s25 = sphi %s4037_s25, %s5185_s25  }
   0x8   : > { %s3398_s30 = sadd.s32 4294967294, %s3962_s28   ;;  %s4062_s14 = sadd.s32 1, %s3962_s28  }
   0x9   : > { %5172 = sst [smem:[#allocation6_spill]] %s4062_s14  ;;  %s351_s15 = sadd.s32 1, %s3958_s27 }
   0xa   : > { %s348_s16 = ssub.s32 %s3962_s28, %s4062_s14  ;;  %p361_p0 = scmp.ne.s32.totalorder %s3958_s27, %s3954_s26 }
   0xb   : > { %p349_p1 = scmp.eq.s32.totalorder %s348_s16, 0  ;;  %p362_p2 = scmp.eq.s32.totalorder %s4058_s29, 1 }
   0xc   : > { %p367_p3 = scmp.ne.s32.totalorder %s3954_s26, %s3950_s25  ;;  %p368_p4 = scmp.eq.s32.totalorder %s3398_s30, 1 }
   0xd   : > { %s4073_s17 = scalar_select %p349_p1, %s3958_s27, %s351_s15  }
   0xe   : > { %p4075_p5 = por %p362_p2, %p361_p0  ;;  %p4079_p6 = por %p368_p4, %p367_p3 }
   0xf   : > { %5173 = sst [smem:[#allocation7_spill]] %s4073_s17  ;;  %p3401_p7 = scmp.ge.s32.totalorder %s3962_s28, 1 }
  0x10   : > { %s5175_s19 = scalar_select %p4079_p6, 1, 0 }
  0x11   : > { %p484_p8 = scmp.lt.s32.totalorder %s3962_s28, 3 }
  0x12   : > { %5176 = sst [smem:[#allocation8_spill]] %s5175_s19 }
  0x13   : > { %p485_p9 = pnand %p3401_p7, %p484_p8 }
  0x14   : > { %s3403_s20 = sshll.u32 (!%p485_p9), %s4058_s29, 3  ;;  %v781_v0 = vlaneseq (!%p485_p9)  ;;  %s5177_s6 = sld [smem:[#allocation10_spill]] (!%p485_p9)  ;;  %vm1373_vm0 = vcmask (!%p485_p9), 261120   ;;  %vm2022_vm1 = vcmask (!%p485_p9), 130048  }
  0x15   : > { %488 = sbr.rel (%p485_p9) target bundleno = 1295 (0x50f), region = 72  ;;  %p574_p10 = scmp.lt.s32.totalorder (!%p485_p9), %s3403_s20, 15 }
  0x16   : > { %v782_v1 = vshrl.u32 (!%p485_p9), %v781_v0, 7  ;;  %s5178_s0 = sld [smem:[#allocation9_spill]] (!%p485_p9)  ;;  %s5179_s7 = sld [smem:[#allocation11_spill]] (!%p485_p9) }
  0x18   : > { %v4088_v2 = vsub.s32 (!%p485_p9), 1, %v782_v1 }
  0x1c   : > { %s5188_s20 = smov (!%p574_p10, %s3403_s20), 15 }
  0x1d   : > { %s4091_s21 = sshll.u32 %s5188_s20, 1  ;;  %s5163_s30 = sshll.u32 %s5188_s20, 4 }
  0x1e   : > { %s4097_s24 = scalar_lea.vmem %s5177_s6, %s4091_s21  ;;  %s4109_s22 = scalar_lea.vmem %s5178_s0, %s5163_s30 }
  0x1f   : > { %v710_v3 = vld [vmem:[%s4097_s24 + $0x2] sm:$0x3]  ;;  %v709_v4 = vld [vmem:[%s4097_s24] sm:$0x3]  ;;  %v711_v8 = vld [vmem:[%s4097_s24 + $0x4] sm:$0x3]  ;;  %s4131_s16 = scalar_lea.vmem %s5179_s7, %s4091_s21  ;;  %s4163_s19 = scalar_lea.vmem %s5154_s5, %s4091_s21 }
  0x20   : > { %v803_v5 = vrot.slane %v710_v3, %v4088_v2  ;;  %v784_v6 = vrot.slane %v709_v4, %v4088_v2  ;;  %v633_v7 = vld [vmem:[%s4109_s22] sm:$0xff]  ;;  %v635_v9 = vld [vmem:[%s4109_s22 + $0x10] sm:$0xff]  ;;  %v822_v10 = vrot.slane %v711_v8, %v4088_v2  ;;  %v713_v13 = vld [vmem:[%s4097_s24 + $0x8] sm:$0x3]  ;;  %s3471_s23 = sshll.u32 %s5188_s20, 6  ;;  %s570_s6 = sand.u32 1, %s3954_s26  }
  0x21   : > { %3563 = vmatprep.mubr.msk.f32.mxu0 %vm1373_vm0, %v633_v7  ;;  %3574 = vmatprep.mubr.msk.f32.mxu1 %vm1373_vm0, %v635_v9  ;;  %v712_v11 = vld [vmem:[%s4097_s24 + $0x6] sm:$0x3]  ;;  %v860_v14 = vrot.slane %v713_v13, %v4088_v2  ;;  %v714_v15 = vld [vmem:[%s4097_s24 + $0xa] sm:$0x3]  ;;  %v715_v17 = vld [vmem:[%s4097_s24 + $0xc] sm:$0x3]  ;;  %s4157_s17 = scalar_lea.vmem %s5152_s3, %s3471_s23  ;;  %s4534_s23 = scalar_lea.vmem %s5157_s8, %s4091_s21 }
  0x22   : > { %805 = vbcast.lane.b32.xlu1 %v803_v5, 256  ;;  %786 = vbcast.lane.b32.xlu0 %v784_v6, 256  ;;  %v841_v12 = vrot.slane %v712_v11, %v4088_v2  ;;  %v879_v16 = vrot.slane %v714_v15, %v4088_v2  ;;  %v898_v18 = vrot.slane %v715_v17, %v4088_v2  ;;  %v716_v19 = vld [vmem:[%s4097_s24 + $0xe] sm:$0x3]  ;;  %v717_v21 = vld [vmem:[%s4131_s16] sm:$0x3] }
  0x23   : > { %v917_v20 = vrot.slane %v716_v19, %v4088_v2  ;;  %v936_v22 = vrot.slane %v717_v21, %v4088_v2  ;;  %v718_v23 = vld [vmem:[%s4131_s16 + $0x2] sm:$0x3]  ;;  %v719_v24 = vld [vmem:[%s4131_s16 + $0x4] sm:$0x3]  ;;  %v720_v27 = vld [vmem:[%s4131_s16 + $0x6] sm:$0x3] }
  0x24   : > { %v947_v25 = vrot.slane %v718_v23, %v4088_v2  ;;  %v958_v26 = vrot.slane %v719_v24, %v4088_v2  ;;  %v969_v28 = vrot.slane %v720_v27, %v4088_v2  ;;  %v721_v29 = vld [vmem:[%s4131_s16 + $0x8] sm:$0x3]  ;;  %v722_v31 = vld [vmem:[%s4131_s16 + $0xa] sm:$0x3]  ;;  %s3469_s24 = sshll.u32 %s5188_s20, 5  ;;  %v737_v35 = vld [vmem:[%s4157_s17 + $0x60] sm:$0xff] }
  0x25   : > { %v980_v30 = vrot.slane %v721_v29, %v4088_v2  ;;  %v991_v32 = vrot.slane %v722_v31, %v4088_v2  ;;  %s4152_s0 = scalar_lea.vmem %s5150_s1, %s3469_s24  ;;  %v702_v34 = vld [vmem:[%s4163_s19 + $0x2] sm:$0x3]  ;;  %v701_v37 = vld [vmem:[%s4163_s19] sm:$0x3]  ;;  %v738_v40 = vld [vmem:[%s4157_s17 + $0x68] sm:$0xff]  ;;  %s3402_s14 = sshll.u32 %s570_s6, 7 }
  0x26   : > { %809 = vbcast.lane.b32.xlu1 %v803_v5, 264  ;;  %790 = vbcast.lane.b32.xlu0 %v784_v6, 264  ;;  %v4166_v33 = vld [vmem:[%s4152_s0 + $0x20] sm:$0xff]  ;;  %v4176_v39 = vld [vmem:[%s4152_s0 + $0x28] sm:$0xff]  ;;  %v1060_v44 = vrot.slane %v702_v34, %v4088_v2  ;;  %v1056_v46 = vrot.slane %v701_v37, %v4088_v2  ;;  %v4190_v49 = vld [vmem:[%s4152_s0 + $0x18] sm:$0xff] }
  0x27   : > { %v4171_v36 = vld [vmem:[%s4152_s0] sm:$0xff]  ;;  %v4180_v41 = vld [vmem:[%s4152_s0 + $0x8] sm:$0xff]  ;;  %v1025_v43 = vsub.f32 %v737_v35, %v4166_v33  ;;  %v1026_v47 = vsub.f32 %v738_v40, %v4176_v39  ;;  %v736_v50 = vld [vmem:[%s4157_s17 + $0x38] sm:$0xff] }
  0x28   : > { %v733_v38 = vld [vmem:[%s4157_s17 + $0x20] sm:$0xff]  ;;  %v734_v42 = vld [vmem:[%s4157_s17 + $0x28] sm:$0xff]  ;;  %v4194_v51 = vld [vmem:[%s4152_s0 + $0x10] sm:$0xff]  ;;  %v1024_v59 = vsub.f32 %v736_v50, %v4190_v49 }
  0x29   : > { %v1021_v45 = vsub.f32 %v733_v38, %v4171_v36  ;;  %v1022_v48 = vsub.f32 %v734_v42, %v4180_v41  ;;  %v735_v52 = vld [vmem:[%s4157_s17 + $0x30] sm:$0xff]  ;;  %v1089_v53 = vmul.f32 %v1060_v44, %v1025_v43  ;;  %v4198_v55 = vld [vmem:[%s4152_s0 + $0x38] sm:$0xff]  ;;  %v1090_v57 = vmul.f32 %v1060_v44, %v1026_v47  ;;  %v4209_v0 = vld [vmem:[%s4152_s0 + $0x48] sm:$0xff] }
  0x2a   : > { %798 = vbcast.lane.b32.xlu1 %v784_v6, 280  ;;  %794 = vbcast.lane.b32.xlu0 %v784_v6, 272  ;;  %v740_v56 = vld [vmem:[%s4157_s17 + $0x78] sm:$0xff]  ;;  %v1023_v60 = vsub.f32 %v735_v52, %v4194_v51  ;;  %v4204_v61 = vld [vmem:[%s4152_s0 + $0x30] sm:$0xff]  ;;  %v703_v1 = vld [vmem:[%s4163_s19 + $0x4] sm:$0x3]  ;;  %v1088_v11 = vmul.f32 %v1056_v46, %v1024_v59 }
  0x2b   : > { %v1085_v54 = vmul.f32 %v1056_v46, %v1021_v45  ;;  %v1086_v58 = vmul.f32 %v1056_v46, %v1022_v48  ;;  %v739_v62 = vld [vmem:[%s4157_s17 + $0x70] sm:$0xff]  ;;  %v1028_v63 = vsub.f32 %v740_v56, %v4198_v55  ;;  %v1121_v3 = vadd.f32 %v1089_v53, %v4166_v33  ;;  %v4216_v6 = vld [vmem:[%s4152_s0 + $0x40] sm:$0xff]  ;;  %v4228_v19 = vld [vmem:[%s4152_s0 + $0x68] sm:$0xff] }
  0x2c   : > { %v741_v7 = vld [vmem:[%s4157_s17 + $0xa0] sm:$0xff]  ;;  %v1027_v8 = vsub.f32 %v739_v62, %v4204_v61  ;;  %v1122_v9 = vadd.f32 %v1090_v57, %v4176_v39  ;;  %v1064_v15 = vrot.slane %v703_v1, %v4088_v2  ;;  %v746_v24 = vld [vmem:[%s4157_s17 + $0xe8] sm:$0xff]  ;;  %v4241_v31 = vld [vmem:[%s4152_s0 + $0x58] sm:$0xff] }
  0x2d   : > { %v1117_v4 = vadd.f32 %v1085_v54, %v4171_v36  ;;  %v1092_v13 = vmul.f32 %v1060_v44, %v1028_v63  ;;  %v1153_v17 = vsub.f32 %v1121_v3, %v4166_v33  ;;  %v704_v23 = vld [vmem:[%s4163_s19 + $0x6] sm:$0x3]  ;;  %v1034_v42 = vsub.f32 %v746_v24, %v4228_v19  ;;  %v4247_v43 = vld [vmem:[%s4152_s0 + $0x50] sm:$0xff]  ;;  %v4289_v24 = vld [vmem:[%s4152_s0 + $0x88] sm:$0xff] }
  0x2e   : > { %817 = vbcast.lane.b32.xlu1 %v803_v5, 280  ;;  %813 = vbcast.lane.b32.xlu0 %v803_v5, 272  ;;  %v742_v5 = vld [vmem:[%s4157_s17 + $0xa8] sm:$0xff]  ;;  %v4252_v48 = vrot.slane %v704_v23, %v4088_v2 }
  0x2f   : > { %v1124_v34 = vadd.f32 %v1092_v13, %v4198_v55 }
  0x32   : > { %828 = vbcast.lane.b32.xlu1 %v822_v10, 264  ;;  %824 = vbcast.lane.b32.xlu0 %v822_v10, 256 }
  0x36   : > { %847 = vbcast.lane.b32.xlu1 %v841_v12, 264  ;;  %843 = vbcast.lane.b32.xlu0 %v841_v12, 256 }
  0x3a   : > { %836 = vbcast.lane.b32.xlu1 %v822_v10, 280  ;;  %832 = vbcast.lane.b32.xlu0 %v822_v10, 272  ;;  %v1118_v10 = vadd.f32 %v1086_v58, %v4180_v41  ;;  %v1156_v58 = vsub.f32 %v1124_v34, %v4198_v55 }
  0x3c   : > { %v1150_v27 = vsub.f32 %v1118_v10, %v4180_v41 }
  0x3e   : > { %855 = vbcast.lane.b32.xlu1 %v841_v12, 280  ;;  %851 = vbcast.lane.b32.xlu0 %v841_v12, 272  ;;  %v1087_v12 = vmul.f32 %v1056_v46, %v1023_v60 }
  0x40   : > { %v1119_v29 = vadd.f32 %v1087_v12, %v4194_v51 }
  0x42   : > { %866 = vbcast.lane.b32.xlu1 %v860_v14, 264  ;;  %862 = vbcast.lane.b32.xlu0 %v860_v14, 256  ;;  %v1151_v57 = vsub.f32 %v1119_v29, %v4194_v51 }
  0x46   : > { %885 = vbcast.lane.b32.xlu1 %v879_v16, 264  ;;  %881 = vbcast.lane.b32.xlu0 %v879_v16, 256 }
  0x4a   : > { %874 = vbcast.lane.b32.xlu1 %v860_v14, 280  ;;  %870 = vbcast.lane.b32.xlu0 %v860_v14, 272  ;;  %v1030_v14 = vsub.f32 %v742_v5, %v4209_v0  ;;  %v4271_v5 = vld [vmem:[%s4152_s0 + $0x78] sm:$0xff] }
  0x4c   : > { %v1094_v35 = vmul.f32 %v1064_v15, %v1030_v14 }
  0x4e   : > { %893 = vbcast.lane.b32.xlu1 %v879_v16, 280  ;;  %889 = vbcast.lane.b32.xlu0 %v879_v16, 272  ;;  %v1029_v16 = vsub.f32 %v741_v7, %v4216_v6  ;;  %v4260_v59 = vadd.f32 %v1094_v35, %v4209_v0  ;;  %v748_v7 = vld [vmem:[%s4157_s17 + $0xf8] sm:$0xff] }
  0x50   : > { %v1093_v37 = vmul.f32 %v1064_v15, %v1029_v16  ;;  %v1158_v14 = vsub.f32 %v4260_v59, %v4209_v0  ;;  %v706_v59 = vld [vmem:[%s4163_s19 + $0xa] sm:$0x3] }
  0x52   : > { %904 = vbcast.lane.b32.xlu1 %v898_v18, 264  ;;  %900 = vbcast.lane.b32.xlu0 %v898_v18, 256  ;;  %v4263_v60 = vadd.f32 %v1093_v37, %v4216_v6  ;;  %v4300_v37 = vld [vmem:[%s4152_s0 + $0x80] sm:$0xff] }
  0x54   : > { %v1157_v23 = vsub.f32 %v4263_v60, %v4216_v6 }
  0x56   : > { %923 = vbcast.lane.b32.xlu1 %v917_v20, 264  ;;  %919 = vbcast.lane.b32.xlu0 %v917_v20, 256 }
  0x5a   : > { %912 = vbcast.lane.b32.xlu1 %v898_v18, 280  ;;  %908 = vbcast.lane.b32.xlu0 %v898_v18, 272  ;;  %v1149_v18 = vsub.f32 %v1117_v4, %v4171_v36 }
  0x5e   : > { %931 = vbcast.lane.b32.xlu1 %v917_v20, 280  ;;  %927 = vbcast.lane.b32.xlu0 %v917_v20, 272 }
  0x62   : > { %938 = vbcast.lane.b32.xlu1 %v936_v22, 256  ;;  %942 = vbcast.lane.b32.xlu0 %v936_v22, 264  ;;  %v1091_v22 = vmul.f32 %v1060_v44, %v1027_v8  ;;  %v743_v44 = vld [vmem:[%s4157_s17 + $0xb0] sm:$0xff] }
  0x63   : > { %v1031_v62 = vsub.f32 %v743_v44, %v4247_v43 }
  0x64   : > { %v1123_v47 = vadd.f32 %v1091_v22, %v4204_v61 }
  0x65   : > { %v1095_v16 = vmul.f32 %v1064_v15, %v1031_v62 }
  0x66   : > { %949 = vbcast.lane.b32.xlu1 %v947_v25, 256  ;;  %960 = vbcast.lane.b32.xlu0 %v958_v26, 256  ;;  %v1155_v10 = vsub.f32 %v1123_v47, %v4204_v61 }
  0x6a   : > { %953 = vbcast.lane.b32.xlu1 %v947_v25, 264  ;;  %971 = vbcast.lane.b32.xlu0 %v969_v28, 256  ;;  %v4233_v25 = vld [vmem:[%s4152_s0 + $0x60] sm:$0xff] }
  0x6e   : > { %964 = vbcast.lane.b32.xlu1 %v958_v26, 264  ;;  %982 = vbcast.lane.b32.xlu0 %v980_v30, 256  ;;  %v1154_v26 = vsub.f32 %v1122_v9, %v4176_v39 }
  0x72   : > { %975 = vbcast.lane.b32.xlu1 %v969_v28, 264  ;;  %993 = vbcast.lane.b32.xlu0 %v991_v32, 256  ;;  %v1120_v28 = vadd.f32 %v1088_v11, %v4190_v49  ;;  %v1098_v11 = vmul.f32 %v4252_v48, %v1034_v42 }
  0x74   : > { %v1152_v56 = vsub.f32 %v1120_v28, %v4190_v49  ;;  %v1130_v29 = vadd.f32 %v1098_v11, %v4228_v19 }
  0x76   : > { %986 = vbcast.lane.b32.xlu1 %v980_v30, 264  ;;  %v745_v30 = vld [vmem:[%s4157_s17 + $0xe0] sm:$0xff] }
  0x77   : > { %v1033_v50 = vsub.f32 %v745_v30, %v4233_v25 }
  0x79   : > { %v1097_v12 = vmul.f32 %v4252_v48, %v1033_v50  ;;  %v634_v50 = vld [vmem:[%s4109_s22 + $0x8] sm:$0xff] }
  0x7a   : > { %997 = vbcast.lane.b32.xlu1 %v991_v32, 264  ;;  %v744_v32 = vld [vmem:[%s4157_s17 + $0xb8] sm:$0xff] }
  0x7b   : > { %v1032_v52 = vsub.f32 %v744_v32, %v4241_v31 }
  0x94   : > { %v806_v20 = vpop.permute.xlu1 %805  ;;  %v787_v21 = vpop.permute.xlu0 %786 }
  0x95   : > { %v1185_v38 = vmul.f32 %v1153_v17, %v806_v20  ;;  %v1181_v40 = vmul.f32 %v1149_v18, %v787_v21  ;;  %v1036_v17 = vsub.f32 %v748_v7, %v4271_v5  ;;  %v4281_v18 = vld [vmem:[%s4152_s0 + $0x70] sm:$0xff] }
  0x96   : > { %v747_v20 = vld [vmem:[%s4157_s17 + $0xf0] sm:$0xff] }
  0x97   : > { %v1213_v63 = vadd.f32 %v1181_v40, %v4171_v36  ;;  %v1217_v3 = vadd.f32 %v1185_v38, %v4166_v33  ;;  %v1096_v36 = vmul.f32 %v1064_v15, %v1032_v52  ;;  %v750_v15 = vld [vmem:[%s4157_s17 + $0x128] sm:$0xff]  ;;  %v1035_v35 = vsub.f32 %v747_v20, %v4281_v18  ;;  %v749_v38 = vld [vmem:[%s4157_s17 + $0x120] sm:$0xff] }
  0x98   : > { %v810_v45 = vpop.permute.xlu1 %809  ;;  %v791_v46 = vpop.permute.xlu0 %790  ;;  %v4304_v40 = vadd.f32 %v1095_v16, %v4247_v43  ;;  %v1100_v42 = vmul.f32 %v4252_v48, %v1036_v17  ;;  %v1038_v44 = vsub.f32 %v750_v15, %v4289_v24  ;;  %v4352_v16 = vld [vmem:[%s4152_s0 + $0x90] sm:$0xff] }
  0x99   : > { %v1186_v53 = vmul.f32 %v1154_v26, %v810_v45  ;;  %v1182_v54 = vmul.f32 %v1150_v27, %v791_v46  ;;  %v705_v26 = vld [vmem:[%s4163_s19 + $0x8] sm:$0x3]  ;;  %v751_v17 = vld [vmem:[%s4157_s17 + $0x130] sm:$0xff] }
  0x9a   : > { %v4309_v45 = vrot.slane %v705_v26, %v4088_v2  ;;  %v639_v26 = vld [vmem:[%s4109_s22 + $0x30] sm:$0xff] }
  0x9b   : > { %v1214_v1 = vadd.f32 %v1182_v54, %v4180_v41  ;;  %v1218_v4 = vadd.f32 %v1186_v53, %v4176_v39  ;;  %v1162_v54 = vsub.f32 %v1130_v29, %v4228_v19 }
  0x9c   : > { %v799_v8 = vpop.permute.xlu1 %798  ;;  %v795_v9 = vpop.permute.xlu0 %794 }
  0x9d   : > { %v1184_v41 = vmul.f32 %v1152_v56, %v799_v8  ;;  %v1183_v33 = vmul.f32 %v1151_v57, %v795_v9  ;;  %v3699_v39 = vpack.c.bf16 %v1214_v1, %v1213_v63  ;;  %v3707_v13 = vpack.c.bf16 %v1218_v4, %v1217_v3  ;;  %v637_v1 = vld [vmem:[%s4109_s22 + $0x20] sm:$0xff] }
  0x9e   : > { %v1037_v57 = vsub.f32 %v749_v38, %v4300_v37  ;;  %v1099_v63 = vmul.f32 %v4252_v48, %v1035_v35  ;;  %v4325_v3 = vld [vmem:[%s4152_s0 + $0xa0] sm:$0xff]  ;;  %v1159_v8 = vsub.f32 %v4304_v40, %v4247_v43  ;;  %v4333_v9 = vadd.f32 %v1100_v42, %v4271_v5 }
  0x9f   : > { %v1216_v21 = vadd.f32 %v1184_v41, %v4190_v49  ;;  %v1215_v22 = vadd.f32 %v1183_v33, %v4194_v51  ;;  %3700 = vmatprep.subr.bf16.mxu0 %v3699_v39  ;;  %3708 = vmatprep.subr.bf16.mxu1 %v3707_v13  ;;  %v1129_v49 = vadd.f32 %v1097_v12, %v4233_v25  ;;  %v753_v4 = vld [vmem:[%s4157_s17 + $0x160] sm:$0xff]  ;;  %v752_v41 = vld [vmem:[%s4157_s17 + $0x138] sm:$0xff] }
  0xa0   : > { %v818_v27 = vpop.permute.xlu1 %817  ;;  %v814_v28 = vpop.permute.xlu0 %813  ;;  %3702 = vmatpush3.bf16.msra.mxu0 %v3699_v39  ;;  %3710 = vmatpush3.bf16.msra.mxu1 %v3707_v13  ;;  %v4296_v51 = vadd.f32 %v1096_v36, %v4241_v31  ;;  %v4341_v36 = vld [vmem:[%s4152_s0 + $0x98] sm:$0xff]  ;;  %v1164_v15 = vsub.f32 %v4333_v9, %v4271_v5 }
  0xa1   : > { %v1188_v30 = vmul.f32 %v1156_v58, %v818_v27  ;;  %v1187_v32 = vmul.f32 %v1155_v10, %v814_v28  ;;  %v3703_v34 = vpack.c.bf16 %v1216_v21, %v1215_v22  ;;  %v1161_v56 = vsub.f32 %v1129_v49, %v4233_v25  ;;  %v4318_v58 = vld [vmem:[%s4152_s0 + $0xa8] sm:$0xff]  ;;  %v636_v13 = vld [vmem:[%s4109_s22 + $0x18] sm:$0xff] }
  0xa2   : > { %v1160_v7 = vsub.f32 %v4296_v51, %v4241_v31  ;;  %v1102_v10 = vmul.f32 %v4309_v45, %v1038_v44  ;;  %v1040_v28 = vsub.f32 %v752_v41, %v4341_v36  ;;  %v1039_v51 = vsub.f32 %v751_v17, %v4352_v16 }
  0xa3   : > { %v1220_v46 = vadd.f32 %v1188_v30, %v4198_v55  ;;  %v1219_v47 = vadd.f32 %v1187_v32, %v4204_v61  ;;  %3704 = vmatprep.subr.bf16.mxu0 %v3703_v34  ;;  %v754_v55 = vld [vmem:[%s4157_s17 + $0x168] sm:$0xff]  ;;  %v4368_v30 = vld [vmem:[%s4152_s0 + $0xb8] sm:$0xff] }
  0xa4   : > { %v829_v52 = vpop.permute.xlu1 %828  ;;  %v825_v53 = vpop.permute.xlu0 %824  ;;  %3706 = vmatpush3.bf16.msra.mxu0 %v3703_v34  ;;  %v1042_v12 = vsub.f32 %v754_v55, %v4318_v58  ;;  %v4360_v27 = vadd.f32 %v1102_v10, %v4289_v24  ;;  %v756_v32 = vld [vmem:[%s4157_s17 + $0x178] sm:$0xff]  ;;  %v1104_v55 = vmul.f32 %v4309_v45, %v1040_v28 }
  0xa5   : > { %v1190_v60 = vmul.f32 %v1158_v14, %v829_v52  ;;  %v1189_v61 = vmul.f32 %v1157_v23, %v825_v53  ;;  %v3711_v62 = vpack.c.bf16 %v1220_v46, %v1219_v47  ;;  %v1101_v14 = vmul.f32 %v4309_v45, %v1037_v57  ;;  %v4377_v47 = vld [vmem:[%s4152_s0 + $0xb0] sm:$0xff]  ;;  %v4382_v53 = vld [vmem:[%s4152_s0 + $0xc8] sm:$0xff] }
  0xa6   : > { %v1131_v23 = vadd.f32 %v1099_v63, %v4281_v18  ;;  %v755_v52 = vld [vmem:[%s4157_s17 + $0x170] sm:$0xff] }
  0xa7   : > { %v1222_v11 = vadd.f32 %v1190_v60, %v4209_v0  ;;  %v1221_v48 = vadd.f32 %v1189_v61, %v4216_v6  ;;  %3564 = vmatmul.mubr.msk.f32.vlgmr.msra.gmra.mrb[0].mxu0 %vm1373_vm0, %v634_v50  ;;  %3712 = vmatprep.subr.bf16.mxu1 %v3711_v62  ;;  %v4348_v0 = vrot.slane %v706_v59, %v4088_v2  ;;  %v758_v60 = vld [vmem:[%s4157_s17 + $0x1a8] sm:$0xff]  ;;  %v4392_v61 = vld [vmem:[%s4152_s0 + $0xc0] sm:$0xff] }
  0xa8   : > { %v848_v33 = vpop.permute.xlu1 %847  ;;  %v844_v39 = vpop.permute.xlu0 %843  ;;  %3714 = vmatpush3.bf16.msra.mxu1 %v3711_v62  ;;  %3585 = vmatprep.mubr.msk.f32.mxu0 %vm1373_vm0, %v637_v1  ;;  %v1041_v6 = vsub.f32 %v753_v4, %v4325_v3  ;;  %v1133_v38 = vadd.f32 %v1101_v14, %v4300_v37  ;;  %v1163_v46 = vsub.f32 %v1131_v23, %v4281_v18  ;;  %v757_v62 = vld [vmem:[%s4157_s17 + $0x1a0] sm:$0xff]  ;;  %v762_v14 = vld [vmem:[%s4157_s17 + $0x1e8] sm:$0xff] }
  0xa9   : > { %v1194_v20 = vmul.f32 %v1162_v54, %v848_v33  ;;  %v1193_v21 = vmul.f32 %v1161_v56, %v844_v39  ;;  %v3715_v22 = vpack.c.bf16 %v1222_v11, %v1221_v48  ;;  %v1044_v50 = vsub.f32 %v756_v32, %v4368_v30  ;;  %v707_v54 = vld [vmem:[%s4163_s19 + $0xc] sm:$0x3] }
  0xaa   : > { %v1166_v59 = vsub.f32 %v4360_v27, %v4289_v24  ;;  %v1165_v4 = vsub.f32 %v1133_v38, %v4300_v37  ;;  %v1043_v11 = vsub.f32 %v755_v52, %v4377_v47  ;;  %v4403_v41 = vrot.slane %v707_v54, %v4088_v2  ;;  %v760_v52 = vld [vmem:[%s4157_s17 + $0x1b8] sm:$0xff] }
  0xab   : > { %v1226_v29 = vadd.f32 %v1194_v20, %v4228_v19  ;;  %v1225_v49 = vadd.f32 %v1193_v21, %v4233_v25  ;;  %3575 = vmatmul.mubr.msk.f32.vlgmr.msra.gmra.mrb[0].mxu1 %vm1373_vm0, %v636_v13  ;;  %3716 = vmatprep.subr.bf16.mxu0 %v3715_v22  ;;  %v1106_v19 = vmul.f32 %v4348_v0, %v1042_v12  ;;  %v4409_v13 = vld [vmem:[%s4152_s0 + $0xe8] sm:$0xff] }
  0xac   : > { %v837_v34 = vpop.permute.xlu1 %836  ;;  %v833_v35 = vpop.permute.xlu0 %832  ;;  %3718 = vmatpush3.bf16.msra.mxu0 %v3715_v22  ;;  %v1105_v25 = vmul.f32 %v4348_v0, %v1041_v6  ;;  %3596 = vmatprep.mubr.msk.f32.mxu1 %vm1373_vm0, %v639_v26  ;;  %v1108_v48 = vmul.f32 %v4348_v0, %v1044_v50  ;;  %v1046_v12 = vsub.f32 %v758_v60, %v4382_v53  ;;  %v638_v20 = vld [vmem:[%s4109_s22 + $0x28] sm:$0xff]  ;;  %v4448_v60 = vld [vmem:[%s4152_s0 + $0xd0] sm:$0xff] }
  0xad   : > { %v1192_v40 = vmul.f32 %v1160_v7, %v837_v34  ;;  %v1191_v42 = vmul.f32 %v1159_v8, %v833_v35  ;;  %v3723_v44 = vpack.c.bf16 %v1226_v29, %v1225_v49  ;;  %v1103_v7 = vmul.f32 %v4309_v45, %v1039_v51  ;;  %v641_v29 = vld [vmem:[%s4109_s22 + $0x40] sm:$0xff] }
  0xae   : > { %v1045_v33 = vsub.f32 %v757_v62, %v4392_v61  ;;  %v1136_v23 = vadd.f32 %v1104_v55, %v4341_v36  ;;  %v1107_v28 = vmul.f32 %v4348_v0, %v1043_v11  ;;  %v4421_v49 = vld [vmem:[%s4152_s0 + $0xe0] sm:$0xff]  ;;  %v4425_v32 = vadd.f32 %v1108_v48, %v4368_v30  ;;  %v643_v55 = vld [vmem:[%s4109_s22 + $0x50] sm:$0xff] }
  0xaf   : > { %v1224_v56 = vadd.f32 %v1192_v40, %v4241_v31  ;;  %v1223_v57 = vadd.f32 %v1191_v42, %v4247_v43  ;;  %3724 = vmatprep.subr.bf16.mxu1 %v3723_v44  ;;  %v1138_v31 = vadd.f32 %v1106_v19, %v4318_v58  ;;  %v1137_v43 = vadd.f32 %v1105_v25, %v4325_v3  ;;  %v761_v51 = vld [vmem:[%s4157_s17 + $0x1e0] sm:$0xff]  ;;  %v759_v62 = vld [vmem:[%s4157_s17 + $0x1b0] sm:$0xff] }
  0xb0   : > { %v856_v63 = vpop.permute.xlu1 %855  ;;  %v852_v1 = vpop.permute.xlu0 %851  ;;  %3726 = vmatpush3.bf16.msra.mxu1 %v3723_v44  ;;  %v1110_v34 = vmul.f32 %v4403_v41, %v1046_v12  ;;  %v1109_v35 = vmul.f32 %v4403_v41, %v1045_v33  ;;  %v1050_v38 = vsub.f32 %v762_v14, %v4409_v13  ;;  %v640_v44 = vld [vmem:[%s4109_s22 + $0x38] sm:$0xff]  ;;  %v1047_v11 = vsub.f32 %v759_v62, %v4448_v60 }
  0xb1   : > { %v1196_v8 = vmul.f32 %v1164_v15, %v856_v63  ;;  %v1195_v9 = vmul.f32 %v1163_v46, %v852_v1  ;;  %v3719_v10 = vpack.c.bf16 %v1224_v56, %v1223_v57  ;;  %v1170_v21 = vsub.f32 %v1138_v31, %v4318_v58 }
  0xb2   : > { %v1169_v22 = vsub.f32 %v1137_v43, %v4325_v3  ;;  %v1168_v46 = vsub.f32 %v1136_v23, %v4341_v36  ;;  %v1172_v63 = vsub.f32 %v4425_v32, %v4368_v30  ;;  %v1142_v1 = vadd.f32 %v1110_v34, %v4382_v53 }
  0xb3   : > { %v1228_v39 = vadd.f32 %v1196_v8, %v4271_v5  ;;  %v1227_v45 = vadd.f32 %v1195_v9, %v4281_v18  ;;  %3720 = vmatprep.subr.bf16.mxu0 %v3719_v10  ;;  %v1135_v5 = vadd.f32 %v1103_v7, %v4352_v16  ;;  %v708_v18 = vld [vmem:[%s4163_s19 + $0xe] sm:$0x3]  ;;  %s4528_s19 = scalar_lea.vmem %s5153_s4, %s3469_s24 }
  0xb4   : > { %v867_v6 = vpop.permute.xlu1 %866  ;;  %v863_v17 = vpop.permute.xlu0 %862  ;;  %3722 = vmatpush3.bf16.msra.mxu0 %v3719_v10  ;;  %v4434_v25 = vrot.slane %v708_v18, %v4088_v2  ;;  %v1174_v14 = vsub.f32 %v1142_v1, %v4382_v53 }
  0xb5   : > { %v1198_v26 = vmul.f32 %v1166_v59, %v867_v6  ;;  %v1197_v15 = vmul.f32 %v1165_v4, %v863_v17  ;;  %v3727_v27 = vpack.c.bf16 %v1228_v39, %v1227_v45  ;;  %v1167_v50 = vsub.f32 %v1135_v5, %v4352_v16  ;;  %v4465_v39 = vld [vmem:[%s4152_s0 + $0xf8] sm:$0xff]  ;;  %v4470_v6 = vld [vmem:[%s4152_s0 + $0xf0] sm:$0xff] }
  0xb6   : > { %v1139_v59 = vadd.f32 %v1107_v28, %v4377_v47  ;;  %v1141_v4 = vadd.f32 %v1109_v35, %v4392_v61  ;;  %v1114_v7 = vmul.f32 %v4434_v25, %v1050_v38  ;;  %v764_v45 = vld [vmem:[%s4157_s17 + $0x1f8] sm:$0xff]  ;;  %v763_v17 = vld [vmem:[%s4157_s17 + $0x1f0] sm:$0xff]  ;;  %s5024_s17 = scalar_lea.vmem [#allocation2], %s3402_s14 }
  0xb7   : > { %v1230_v19 = vadd.f32 %v1198_v26, %v4289_v24  ;;  %v1229_v0 = vadd.f32 %v1197_v15, %v4300_v37  ;;  %3586 = vmatmul.mubr.msk.f32.vlgmr.msra.gmra.mrb[2].mxu0 %vm1373_vm0, %v638_v20  ;;  %3728 = vmatprep.subr.bf16.mxu1 %v3727_v27  ;;  %v1049_v24 = vsub.f32 %v761_v51, %v4421_v49  ;;  %v4442_v37 = vld [vmem:[%s4152_s0 + $0xd8] sm:$0xff]  ;;  %s5180_s0 = sshll.u32 %s5188_s20, 4  ;;  %s3240_s30 = sshll.u32 %s5024_s17, 4  ;;  %s5100_s30 = int_to_ptr.vmem [resolvable:$true] %s3240_s30 }
  0xb8   : > { %v886_v40 = vpop.permute.xlu1 %885  ;;  %v882_v42 = vpop.permute.xlu0 %881  ;;  %3730 = vmatpush3.bf16.msra.mxu1 %v3727_v27  ;;  %3607 = vmatprep.mubr.msk.f32.mxu0 %vm1373_vm0, %v641_v29  ;;  %v1171_v33 = vsub.f32 %v1139_v59, %v4377_v47  ;;  %v1146_v23 = vadd.f32 %v1114_v7, %v4409_v13  ;;  %v1111_v27 = vmul.f32 %v4403_v41, %v1047_v11  ;;  %v644_v59 = vld [vmem:[%s4109_s22 + $0x58] sm:$0xff]  ;;  %s4521_s27 = scalar_lea.vmem %s5151_s2, %s5180_s0  ;;  %s3900_s21 = scalar_lea.vmem %s5100_s30, 2048 }
  0xb9   : > { %v1202_v54 = vmul.f32 %v1170_v21, %v886_v40  ;;  %v1201_v56 = vmul.f32 %v1169_v22, %v882_v42  ;;  %v3731_v57 = vpack.c.bf16 %v1230_v19, %v1229_v0  ;;  %v1113_v10 = vmul.f32 %v4434_v25, %v1049_v24  ;;  %v642_v0 = vld [vmem:[%s4109_s22 + $0x48] sm:$0xff]  ;;  %v645_v24 = vld [vmem:[%s4109_s22 + $0x60] sm:$0xff]  ;;  %p3901_p11 = scmp.ne.s32.totalorder %s5100_s30, %s3900_s21 }
  0xba   : > { %v1173_v22 = vsub.f32 %v1141_v4, %v4392_v61  ;;  %v1052_v28 = vsub.f32 %v764_v45, %v4465_v39  ;;  %v1051_v51 = vsub.f32 %v763_v17, %v4470_v6  ;;  %v1178_v35 = vsub.f32 %v1146_v23, %v4409_v13  ;;  %v647_v4 = vld [vmem:[%s4109_s22 + $0x70] sm:$0xff] }
  0xbb   : > { %v1234_v31 = vadd.f32 %v1202_v54, %v4318_v58  ;;  %v1233_v43 = vadd.f32 %v1201_v56, %v4325_v3  ;;  %3597 = vmatmul.mubr.msk.f32.vlgmr.msra.gmra.mrb[2].mxu1 %vm1373_vm0, %v640_v44  ;;  %3732 = vmatprep.subr.bf16.mxu0 %v3731_v57  ;;  %v1048_v58 = vsub.f32 %v760_v52, %v4442_v37  ;;  %v683_v23 = vld [vmem:[%s4521_s27 + $0x10] sm:$0xff]  ;;  %p3902_p12 = pnand %p3901_p11, %p4075_p5 }
  0xbc   : > { %v875_v8 = vpop.permute.xlu1 %874  ;;  %v871_v9 = vpop.permute.xlu0 %870  ;;  %3734 = vmatpush3.bf16.msra.mxu0 %v3731_v57  ;;  %3618 = vmatprep.mubr.msk.f32.mxu1 %vm1373_vm0, %v643_v55  ;;  %v1145_v26 = vadd.f32 %v1113_v10, %v4421_v49  ;;  %v1143_v42 = vadd.f32 %v1111_v27, %v4448_v60  ;;  %v1116_v44 = vmul.f32 %v4434_v25, %v1052_v28  ;;  %v682_v28 = vld [vmem:[%s4521_s27 + $0x8] sm:$0xff] }
  0xbd   : > { %v1200_v3 = vmul.f32 %v1168_v46, %v875_v8  ;;  %v1199_v48 = vmul.f32 %v1167_v50, %v871_v9  ;;  %v3739_v12 = vpack.c.bf16 %v1234_v31, %v1233_v43  ;;  %v1112_v15 = vmul.f32 %v4403_v41, %v1048_v58  ;;  %p3903_p13 = pneg %p3902_p12 }
  0xbe   : > { %v1177_v41 = vsub.f32 %v1145_v26, %v4421_v49  ;;  %v1175_v62 = vsub.f32 %v1143_v42, %v4448_v60 }
  0xbf   : > { %v1232_v20 = vadd.f32 %v1200_v3, %v4341_v36  ;;  %v1231_v21 = vadd.f32 %v1199_v48, %v4352_v16  ;;  %3740 = vmatprep.subr.bf16.mxu1 %v3739_v12  ;;  %v1144_v40 = vadd.f32 %v1112_v15, %v4442_v37  ;;  %v767_v15 = vld [vmem:[%s4528_s19 + $0x30] sm:$0xff] }
  0xc0   : > { %v894_v5 = vpop.permute.xlu1 %893  ;;  %v890_v18 = vpop.permute.xlu0 %889  ;;  %3742 = vmatpush3.bf16.msra.mxu1 %v3739_v12  ;;  %v1247_v27 = vsub.f32 %v767_v15, %v683_v23 }
  0xc1   : > { %v1204_v36 = vmul.f32 %v1172_v63, %v894_v5  ;;  %v1203_v29 = vmul.f32 %v1171_v33, %v890_v18  ;;  %v3735_v16 = vpack.c.bf16 %v1232_v20, %v1231_v21  ;;  %v1176_v55 = vsub.f32 %v1144_v40, %v4442_v37  ;;  %v725_v18 = vld [vmem:[%s4534_s23] sm:$0x3] }
  0xc2   : > { %v1148_v63 = vadd.f32 %v1116_v44, %v4465_v39 }
  0xc3   : > { %v1236_v32 = vadd.f32 %v1204_v36, %v4368_v30  ;;  %v1235_v34 = vadd.f32 %v1203_v29, %v4377_v47  ;;  %3736 = vmatprep.subr.bf16.mxu0 %v3735_v16  ;;  %v1115_v47 = vmul.f32 %v4434_v25, %v1051_v51  ;;  %v766_v36 = vld [vmem:[%s4528_s19 + $0x18] sm:$0xff]  ;;  %v726_v51 = vld [vmem:[%s4534_s23 + $0x2] sm:$0x3] }
  0xc4   : > { %v905_v38 = vpop.permute.xlu1 %904  ;;  %v901_v19 = vpop.permute.xlu0 %900  ;;  %3738 = vmatpush3.bf16.msra.mxu0 %v3735_v16  ;;  %v1180_v9 = vsub.f32 %v1148_v63, %v4465_v39  ;;  %v684_v29 = vld [vmem:[%s4521_s27 + $0x18] sm:$0xff] }
  0xc5   : > { %v1206_v30 = vmul.f32 %v1174_v14, %v905_v38  ;;  %v1205_v46 = vmul.f32 %v1173_v22, %v901_v19  ;;  %v3743_v50 = vpack.c.bf16 %v1236_v32, %v1235_v34  ;;  %v765_v22 = vld [vmem:[%s4528_s19 + $0x10] sm:$0xff]  ;;  %v1246_v32 = vsub.f32 %v766_v36, %v682_v28  ;;  %v768_v34 = vld [vmem:[%s4528_s19 + $0x38] sm:$0xff] }
  0xc7   : > { %v1238_v52 = vadd.f32 %v1206_v30, %v4382_v53  ;;  %v1237_v54 = vadd.f32 %v1205_v46, %v4392_v61  ;;  %3608 = vmatmul.mubr.msk.f32.vlgmr.msra.gmra.mrb[4].mxu0 %vm1373_vm0, %v642_v0  ;;  %3744 = vmatprep.subr.bf16.mxu1 %v3743_v50  ;;  %v1147_v61 = vadd.f32 %v1115_v47, %v4470_v6  ;;  %v685_v0 = vld [vmem:[%s4521_s27 + $0x20] sm:$0xff]  ;;  %v686_v46 = vld [vmem:[%s4521_s27 + $0x28] sm:$0xff] }
  0xc8   : > { %v924_v56 = vpop.permute.xlu1 %923  ;;  %v920_v57 = vpop.permute.xlu0 %919  ;;  %3746 = vmatpush3.bf16.msra.mxu1 %v3743_v50  ;;  %3629 = vmatprep.mubr.msk.f32.mxu0 %vm1373_vm0, %v645_v24  ;;  %v1248_v30 = vsub.f32 %v768_v34, %v684_v29  ;;  %v770_v50 = vld [vmem:[%s4528_s19 + $0x58] sm:$0xff]  ;;  %v1316_v47 = vrot.slane %v726_v51, %v4088_v2 }
  0xc9   : > { %v1210_v25 = vmul.f32 %v1178_v35, %v924_v56  ;;  %v1209_v53 = vmul.f32 %v1177_v41, %v920_v57  ;;  %v3747_v1 = vpack.c.bf16 %v1238_v52, %v1237_v54  ;;  %v1179_v3 = vsub.f32 %v1147_v61, %v4470_v6  ;;  %v769_v41 = vld [vmem:[%s4528_s19 + $0x50] sm:$0xff] }
  0xca   : > { %v1312_v35 = vrot.slane %v725_v18, %v4088_v2  ;;  %v1249_v24 = vsub.f32 %v769_v41, %v685_v0  ;;  %v687_v52 = vld [vmem:[%s4521_s27 + $0x30] sm:$0xff] }
  0xcb   : > { %v1242_v31 = vadd.f32 %v1210_v25, %v4409_v13  ;;  %v1241_v43 = vadd.f32 %v1209_v53, %v4421_v49  ;;  %3619 = vmatmul.mubr.msk.f32.vlgmr.msra.gmra.mrb[4].mxu1 %vm1373_vm0, %v644_v59  ;;  %3748 = vmatprep.subr.bf16.mxu0 %v3747_v1  ;;  %v771_v54 = vld [vmem:[%s4528_s19 + $0x70] sm:$0xff]  ;;  %v1250_v25 = vsub.f32 %v770_v50, %v686_v46 }
  0xcc   : > { %v913_v7 = vpop.permute.xlu1 %912  ;;  %v909_v8 = vpop.permute.xlu0 %908  ;;  %3750 = vmatpush3.bf16.msra.mxu0 %v3747_v1  ;;  %3640 = vmatprep.mubr.msk.f32.mxu1 %vm1373_vm0, %v647_v4  ;;  %v773_v50 = vld [vmem:[%s4528_s19 + $0x90] sm:$0xff] }
  0xcd   : > { %v1208_v10 = vmul.f32 %v1176_v55, %v913_v7  ;;  %v1207_v58 = vmul.f32 %v1175_v62, %v909_v8  ;;  %v3755_v11 = vpack.c.bf16 %v1242_v31, %v1241_v43  ;;  %v727_v55 = vld [vmem:[%s4534_s23 + $0x4] sm:$0x3]  ;;  %v1251_v62 = vsub.f32 %v771_v54, %v687_v52 }
  0xce   : > { %v1320_v7 = vrot.slane %v727_v55, %v4088_v2 }
  0xcf   : > { %v1240_v13 = vadd.f32 %v1208_v10, %v4442_v37  ;;  %v1239_v49 = vadd.f32 %v1207_v58, %v4448_v60  ;;  %3756 = vmatprep.subr.bf16.mxu1 %v3755_v11  ;;  %v646_v37 = vld [vmem:[%s4109_s22 + $0x68] sm:$0xff]  ;;  %v648_v60 = vld [vmem:[%s4109_s22 + $0x78] sm:$0xff] }
  0xd0   : > { %v932_v48 = vpop.permute.xlu1 %931  ;;  %v928_v12 = vpop.permute.xlu0 %927  ;;  %3758 = vmatpush3.bf16.msra.mxu1 %v3755_v11  ;;  %v772_v10 = vld [vmem:[%s4528_s19 + $0x78] sm:$0xff] }
  0xd1   : > { %v1212_v33 = vmul.f32 %v1180_v9, %v932_v48  ;;  %v1211_v45 = vmul.f32 %v1179_v3, %v928_v12  ;;  %v3751_v14 = vpack.c.bf16 %v1240_v13, %v1239_v49  ;;  %v688_v9 = vld [vmem:[%s4521_s27 + $0x38] sm:$0xff]  ;;  %v728_v48 = vld [vmem:[%s4534_s23 + $0x6] sm:$0x3] }
  0xd3   : > { %v1244_v17 = vadd.f32 %v1212_v33, %v4465_v39  ;;  %v1243_v20 = vadd.f32 %v1211_v45, %v4470_v6  ;;  %3752 = vmatprep.subr.bf16.mxu0 %v3751_v14  ;;  %v681_v6 = vld [vmem:[%s4521_s27] sm:$0xff] }
  0xd4   : > { %3754 = vmatpush3.bf16.msra.mxu0 %v3751_v14  ;;  %v939_v39 = vpop.permute.xlu1 %938  ;;  %v943_v5 = vpop.permute.xlu0 %942  ;;  %v1245_v26 = vsub.f32 %v765_v22, %v681_v6 }
  0xd5   : > { %v3759_v21 = vpack.c.bf16 %v1244_v17, %v1243_v20  ;;  %v1262_v44 = vmul.f32 %v1246_v32, %v943_v5 }
  0xd6   : > { %v1261_v16 = vmul.f32 %v1245_v26, %v939_v39 }
  0xd7   : > { %3630 = vmatmul.mubr.msk.f32.vlgmr.msra.gmra.mrb[6].mxu0 %vm1373_vm0, %v646_v37  ;;  %3760 = vmatprep.subr.bf16.mxu1 %v3759_v21  ;;  %v1278_v59 = vadd.f32 %v1262_v44, %v682_v28  ;;  %v1252_v37 = vsub.f32 %v772_v10, %v688_v9  ;;  %v774_v44 = vld [vmem:[%s4528_s19 + $0x98] sm:$0xff] }
  0xd8   : > { %3762 = vmatpush3.bf16.msra.mxu1 %v3759_v21  ;;  %v950_v38 = vpop.permute.xlu1 %949  ;;  %v961_v19 = vpop.permute.xlu0 %960  ;;  %v1277_v40 = vadd.f32 %v1261_v16, %v681_v6  ;;  %v1324_v21 = vrot.slane %v728_v48, %v4088_v2 }
  0xd9   : > { %v1263_v42 = vmul.f32 %v1247_v27, %v950_v38  ;;  %v1265_v53 = vmul.f32 %v1249_v24, %v961_v19  ;;  %v1294_v31 = vsub.f32 %v1278_v59, %v682_v28  ;;  %v729_v59 = vld [vmem:[%s4534_s23 + $0x8] sm:$0x3] }
  0xda   : > { %v1293_v56 = vsub.f32 %v1277_v40, %v681_v6  ;;  %v690_v40 = vld [vmem:[%s4521_s27 + $0x48] sm:$0xff]  ;;  %v1328_v55 = vrot.slane %v729_v59, %v4088_v2 }
  0xdb   : > { %3641 = vmatmul.mubr.msk.f32.vlgmr.msra.gmra.mrb[6].mxu1 %vm1373_vm0, %v648_v60  ;;  %v1279_v57 = vadd.f32 %v1263_v42, %v683_v23  ;;  %v1281_v8 = vadd.f32 %v1265_v53, %v685_v0  ;;  %v1342_v3 = vmul.f32 %v1312_v35, %v1294_v31 }
  0xdc   : > { %v954_v63 = vpop.permute.xlu1 %953  ;;  %v972_v1 = vpop.permute.xlu0 %971  ;;  %v1341_v61 = vmul.f32 %v1312_v35, %v1293_v56 }
  0xdd   : > { %v1295_v4 = vsub.f32 %v1279_v57, %v683_v23  ;;  %v1264_v43 = vmul.f32 %v1248_v30, %v954_v63  ;;  %v1267_v58 = vmul.f32 %v1251_v62, %v972_v1  ;;  %v1297_v33 = vsub.f32 %v1281_v8, %v685_v0  ;;  %v689_v30 = vld [vmem:[%s4521_s27 + $0x40] sm:$0xff] }
  0xde   : > { %v1357_v49 = vadd.f32 %v1341_v61, %v681_v6  ;;  %v1358_v20 = vadd.f32 %v1342_v3, %v682_v28 }
  0xdf   : > { %v1343_v11 = vmul.f32 %v1316_v47, %v1295_v4  ;;  %v1280_v13 = vadd.f32 %v1264_v43, %v684_v29  ;;  %v1283_v45 = vadd.f32 %v1267_v58, %v687_v52  ;;  %v1345_v18 = vmul.f32 %v1320_v7, %v1297_v33 }
  0xe0   : > { %v965_v12 = vpop.permute.xlu1 %964  ;;  %v3763_v26 = vpack.c.bf16 %v1358_v20, %v1357_v49  ;;  %v983_v24 = vpop.permute.xlu0 %982 }
  0xe1   : > { %v1296_v14 = vsub.f32 %v1280_v13, %v684_v29  ;;  %v1266_v17 = vmul.f32 %v1250_v25, %v965_v12  ;;  %v1299_v60 = vsub.f32 %v1283_v45, %v687_v52  ;;  %v1359_v39 = vadd.f32 %v1343_v11, %v683_v23 }
  0xe2   : > { %3764 = vmatprep.subr.bf16.mxu0 %v3763_v26  ;;  %v1361_v34 = vadd.f32 %v1345_v18, %v685_v0  ;;  %v1254_v0 = vsub.f32 %v774_v44, %v690_v40 }
  0xe3   : > { %v1344_v22 = vmul.f32 %v1316_v47, %v1296_v14  ;;  %v1282_v5 = vadd.f32 %v1266_v17, %v686_v46  ;;  %v1347_v16 = vmul.f32 %v1324_v21, %v1299_v60  ;;  %3766 = vmatpush3.bf16.msra.mxu0 %v3763_v26  ;;  %v1253_v47 = vsub.f32 %v773_v50, %v689_v30 }
  0xe4   : > { %v976_v15 = vpop.permute.xlu1 %975 }
  0xe5   : > { %v1298_v27 = vsub.f32 %v1282_v5, %v686_v46  ;;  %v1268_v6 = vmul.f32 %v1252_v37, %v976_v15  ;;  %v1360_v36 = vadd.f32 %v1344_v22, %v684_v29  ;;  %v1363_v41 = vadd.f32 %v1347_v16, %v687_v52 }
  0xe6   : > { %v1269_v56 = vmul.f32 %v1253_v47, %v983_v24 }
  0xe7   : > { %v1346_v51 = vmul.f32 %v1320_v7, %v1298_v27  ;;  %v1284_v28 = vadd.f32 %v1268_v6, %v688_v9  ;;  %v3767_v32 = vpack.c.bf16 %v1360_v36, %v1359_v39 }
  0xe8   : > { %v1285_v52 = vadd.f32 %v1269_v56, %v689_v30 }
  0xe9   : > { %v1300_v23 = vsub.f32 %v1284_v28, %v688_v9  ;;  %3768 = vmatprep.subr.bf16.mxu1 %v3767_v32  ;;  %v1362_v35 = vadd.f32 %v1346_v51, %v686_v46  ;;  %v987_v46 = vpop.permute.xlu1 %986  ;;  %v723_v28 = vld [vmem:[%s4131_s16 + $0xc] sm:$0x3] }
  0xea   : > { %3770 = vmatpush3.bf16.msra.mxu1 %v3767_v32  ;;  %v1270_v54 = vmul.f32 %v1254_v0, %v987_v46  ;;  %v1301_v63 = vsub.f32 %v1285_v52, %v689_v30  ;;  %v1002_v32 = vrot.slane %v723_v28, %v4088_v2 }
  0xeb   : > { %v1348_v38 = vmul.f32 %v1324_v21, %v1300_v23  ;;  %v4560_v19 = vpack.c.bf16 %v1362_v35, %v1361_v34  ;;  %v4631_v34 = vpop.permute.xlu0 %993 }
  0xec   : > { %v1286_v57 = vadd.f32 %v1270_v54, %v690_v40  ;;  %v1349_v53 = vmul.f32 %v1328_v55, %v1301_v63 }
  0xed   : > { %3772 = vmatprep.subr.bf16.mxu0 %v4560_v19  ;;  %v1364_v29 = vadd.f32 %v1348_v38, %v688_v9  ;;  %v4633_v35 = vpop.permute.xlu1 %997 }
  0xee   : > { %v1302_v62 = vsub.f32 %v1286_v57, %v690_v40  ;;  %v1365_v1 = vadd.f32 %v1349_v53, %v689_v30 }
  0xef   : > { %v4564_v42 = vpack.c.bf16 %v1364_v29, %v1363_v41 }
  0xf0   : > { %v1350_v25 = vmul.f32 %v1328_v55, %v1302_v62 }
  0xf1   : > { %3776 = vmatprep.subr.bf16.mxu1 %v4564_v42 }
  0xf2   : > { %v1366_v61 = vadd.f32 %v1350_v25, %v690_v40 }
  0xf4   : > { %v4572_v4 = vpack.c.bf16 %v1366_v61, %v1365_v1 }
 0x17a   : > { %v3565_v31 = vpop.f32.mrb[0].mxu0 }
 0x17b   : > { %v2026_v43 = vsel %vm2022_vm1, %v3565_v31, 0.0  ;;  %v4575_v7 = vpop.f32.mrb[1].mxu0 }
 0x17c   : > { %2027 = vadd.xlane.f32.xlu0 %v2026_v43  ;;  %v2023_v11 = vsel %vm2022_vm1, %v4575_v7, 0.0 }
 0x17e   : > { %v3576_v8 = vpop.f32.mrb[0].mxu1 }
 0x17f   : > { %v1527_v9 = vpop.f32.mrb[1].mxu1  ;;  %v2032_v10 = vsel %vm2022_vm1, %v3576_v8, 0.0 }
 0x180   : > { %2033 = vadd.xlane.f32.xlu0 %v2032_v10  ;;  %v2029_v58 = vsel %vm2022_vm1, %v1527_v9, 0.0 }
 0x181   : > { %2030 = vadd.xlane.f32.xlu1 %v2029_v58 }
 0x184   : > { %2024 = vadd.xlane.f32.xlu0 %v2023_v11 }
 0x18a   : > { %v4581_v3 = vpop.f32.mrb[2].mxu0 }
 0x18b   : > { %v2038_v13 = vsel %vm2022_vm1, %v4581_v3, 0.0  ;;  %v4585_v49 = vpop.f32.mrb[3].mxu0 }
 0x18c   : > { %2039 = vadd.xlane.f32.xlu1 %v2038_v13  ;;  %v2035_v48 = vsel %vm2022_vm1, %v4585_v49, 0.0 }
 0x18e   : > { %v4589_v12 = vpop.f32.mrb[2].mxu1 }
 0x18f   : > { %v2044_v33 = vsel %vm2022_vm1, %v4589_v12, 0.0  ;;  %v4593_v45 = vpop.f32.mrb[3].mxu1 }
 0x190   : > { %2045 = vadd.xlane.f32.xlu0 %v2044_v33  ;;  %2036 = vadd.xlane.f32.xlu1 %v2035_v48  ;;  %v2041_v14 = vsel %vm2022_vm1, %v4593_v45, 0.0 }
 0x194   : > { %2042 = vadd.xlane.f32.xlu0 %v2041_v14 }
 0x19a   : > { %v4597_v17 = vpop.f32.mrb[4].mxu0 }
 0x19b   : > { %v2050_v20 = vsel %vm2022_vm1, %v4597_v17, 0.0  ;;  %v4601_v37 = vpop.f32.mrb[5].mxu0 }
 0x19c   : > { %2051 = vadd.xlane.f32.xlu1 %v2050_v20  ;;  %v2047_v21 = vsel %vm2022_vm1, %v4601_v37, 0.0 }
 0x19e   : > { %v4605_v60 = vpop.f32.mrb[4].mxu1 }
 0x19f   : > { %v2056_v39 = vsel %vm2022_vm1, %v4605_v60, 0.0  ;;  %v4609_v22 = vpop.f32.mrb[5].mxu1 }
 0x1a0   : > { %2057 = vadd.xlane.f32.xlu0 %v2056_v39  ;;  %2048 = vadd.xlane.f32.xlu1 %v2047_v21  ;;  %v2053_v5 = vsel %vm2022_vm1, %v4609_v22, 0.0 }
 0x1a4   : > { %2054 = vadd.xlane.f32.xlu0 %v2053_v5 }
 0x1aa   : > { %v4613_v18 = vpop.f32.mrb[6].mxu0 }
 0x1ab   : > { %v4615_v26 = vpop.f32.mrb[7].mxu0  ;;  %v2062_v15 = vsel %vm2022_vm1, %v4613_v18, 0.0 }
 0x1ac   : > { %2063 = vadd.xlane.f32.xlu1 %v2062_v15  ;;  %v2059_v16 = vsel %vm2022_vm1, %v4615_v26, 0.0 }
 0x1ae   : > { %v4619_v27 = vpop.f32.mrb[6].mxu1 }
 0x1af   : > { %v4621_v6 = vpop.f32.mrb[7].mxu1  ;;  %v2068_v36 = vsel %vm2022_vm1, %v4619_v27, 0.0 }
 0x1b0   : > { %2069 = vadd.xlane.f32.xlu0 %v2068_v36  ;;  %2060 = vadd.xlane.f32.xlu1 %v2059_v16  ;;  %v2065_v51 = vsel %vm2022_vm1, %v4621_v6, 0.0 }
 0x1b4   : > { %2066 = vadd.xlane.f32.xlu0 %v2065_v51 }
 0x1c1   : > { %1008 = vbcast.lane.b32.xlu1 %v1002_v32, 264 }
 0x1ca   : > { %1004 = vbcast.lane.b32.xlu0 %v1002_v32, 256 }
 0x209   : > { %v2028_v23 = vpop.xlane.xlu0 %2027 }
 0x20a   : > { %v2073_v38 = vmul.f32 0.0625, %v2028_v23 }
 0x20c   : > { %v4635_v41 = vsub.f32 %v3565_v31, %v2073_v38 }
 0x20d   : > { %v2034_v29 = vpop.xlane.xlu0 %2033 }
 0x20e   : > { %v2075_v40 = vmul.f32 0.0625, %v2034_v29  ;;  %v2031_v44 = vpop.xlane.xlu1 %2030  ;;  %v2105_v30 = vmul.f32 %v4635_v41, %v4635_v41 }
 0x20f   : > { %v2074_v50 = vmul.f32 0.0625, %v2031_v44 }
 0x210   : > { %v4639_v0 = vsub.f32 %v3576_v8, %v2075_v40  ;;  %v2123_v47 = vsel %vm2022_vm1, %v2105_v30, 0.0 }
 0x211   : > { %v4642_v46 = vsub.f32 %v1527_v9, %v2074_v50  ;;  %v2025_v24 = vpop.xlane.xlu0 %2024  ;;  %2124 = vadd.xlane.f32.xlu1 %v2123_v47 }
 0x212   : > { %v2072_v54 = vmul.f32 0.0625, %v2025_v24  ;;  %v2107_v56 = vmul.f32 %v4639_v0, %v4639_v0 }
 0x213   : > { %v2106_v59 = vmul.f32 %v4642_v46, %v4642_v46 }
 0x214   : > { %v4647_v57 = vsub.f32 %v4575_v7, %v2072_v54  ;;  %v2129_v52 = vsel %vm2022_vm1, %v2107_v56, 0.0 }
 0x215   : > { %2130 = vadd.xlane.f32.xlu0 %v2129_v52  ;;  %v2126_v62 = vsel %vm2022_vm1, %v2106_v59, 0.0 }
 0x216   : > { %v2104_v55 = vmul.f32 %v4647_v57, %v4647_v57 }
 0x218   : > { %v2120_v63 = vsel %vm2022_vm1, %v2104_v55, 0.0 }
 0x219   : > { %2127 = vadd.xlane.f32.xlu0 %v2126_v62  ;;  %v2040_v25 = vpop.xlane.xlu1 %2039  ;;  %2121 = vadd.xlane.f32.xlu1 %v2120_v63 }
 0x21a   : > { %v2077_v53 = vmul.f32 0.0625, %v2040_v25 }
 0x21c   : > { %v4657_v1 = vsub.f32 %v4581_v3, %v2077_v53 }
 0x21d   : > { %v2046_v61 = vpop.xlane.xlu0 %2045  ;;  %v2037_v31 = vpop.xlane.xlu1 %2036 }
 0x21e   : > { %v2079_v43 = vmul.f32 0.0625, %v2046_v61  ;;  %v2076_v7 = vmul.f32 0.0625, %v2037_v31  ;;  %v2109_v8 = vmul.f32 %v4657_v1, %v4657_v1 }
 0x220   : > { %v4662_v9 = vsub.f32 %v4589_v12, %v2079_v43  ;;  %v4665_v10 = vsub.f32 %v4585_v49, %v2076_v7  ;;  %v2135_v58 = vsel %vm2022_vm1, %v2109_v8, 0.0 }
 0x221   : > { %v2043_v11 = vpop.xlane.xlu0 %2042  ;;  %2136 = vadd.xlane.f32.xlu1 %v2135_v58  ;;  %v724_v58 = vld [vmem:[%s4131_s16 + $0xe] sm:$0x3]  ;;  %s3964_s16 = smov [#allocation2]  }
 0x222   : > { %v2078_v13 = vmul.f32 0.0625, %v2043_v11  ;;  %v2111_v3 = vmul.f32 %v4662_v9, %v4662_v9  ;;  %v2108_v48 = vmul.f32 %v4665_v10, %v4665_v10  ;;  %s3904_s24 = sshll.u32 %s3964_s16, 4  ;;  %s3905_s24 = int_to_ptr.vmem [resolvable:$false] %s3904_s24 }
 0x223   : > { %s3906_s15 = scalar_lea.vmem %s3905_s24, 4096  ;;  %p3907_p0 = scmp.lt.s32.totalorder %s5100_s30, %s3905_s24 }
 0x224   : > { %v4673_v33 = vsub.f32 %v4593_v45, %v2078_v13  ;;  %v2141_v12 = vsel %vm2022_vm1, %v2111_v3, 0.0  ;;  %v2132_v14 = vsel %vm2022_vm1, %v2108_v48, 0.0  ;;  %p3908_p1 = scmp.lt.s32.totalorder %s3906_s15, %s3900_s21 }
 0x225   : > { %2142 = vadd.xlane.f32.xlu0 %v2141_v12  ;;  %2133 = vadd.xlane.f32.xlu1 %v2132_v14 }
 0x226   : > { %v2110_v49 = vmul.f32 %v4673_v33, %v4673_v33  ;;  %p3909_p2 = por %p3908_p1, %p3907_p0 }
 0x228   : > { %v2138_v20 = vsel %vm2022_vm1, %v2110_v49, 0.0  ;;  %v4735_v49 = vld [vmem:[%s4521_s27 + $0x50] sm:$0xff]  ;;  %p3910_p3 = pnand %p3909_p2, %p3903_p13 }
 0x229   : > { %2139 = vadd.xlane.f32.xlu0 %v2138_v20  ;;  %v2052_v21 = vpop.xlane.xlu1 %2051  ;;  %v775_v20 = vld [vmem:[%s4528_s19 + $0xb0] sm:$0xff] }
 0x22a   : > { %v2081_v39 = vmul.f32 0.0625, %v2052_v21 }
 0x22c   : > { %v4681_v5 = vsub.f32 %v4597_v17, %v2081_v39  ;;  %v4739_v39 = vld [vmem:[%s4521_s27 + $0x58] sm:$0xff] }
 0x22d   : > { %v2058_v15 = vpop.xlane.xlu0 %2057  ;;  %v2049_v45 = vpop.xlane.xlu1 %2048 }
 0x22e   : > { %v2083_v36 = vmul.f32 0.0625, %v2058_v15  ;;  %v2080_v16 = vmul.f32 0.0625, %v2049_v45  ;;  %v2113_v51 = vmul.f32 %v4681_v5, %v4681_v5  ;;  %v776_v15 = vld [vmem:[%s4528_s19 + $0xb8] sm:$0xff] }
 0x230   : > { %v4686_v28 = vsub.f32 %v4605_v60, %v2083_v36  ;;  %v4689_v32 = vsub.f32 %v4601_v37, %v2080_v16  ;;  %v2147_v23 = vsel %vm2022_vm1, %v2113_v51, 0.0  ;;  %v1255_v36 = vsub.f32 %v775_v20, %v4735_v49 }
 0x231   : > { %v2055_v38 = vpop.xlane.xlu0 %2054  ;;  %2148 = vadd.xlane.f32.xlu1 %v2147_v23  ;;  %v1256_v23 = vsub.f32 %v776_v15, %v4739_v39 }
 0x232   : > { %v2082_v29 = vmul.f32 0.0625, %v2055_v38  ;;  %v2115_v17 = vmul.f32 %v4686_v28, %v4686_v28  ;;  %v2112_v40 = vmul.f32 %v4689_v32, %v4689_v32 }
 0x234   : > { %v4697_v44 = vsub.f32 %v4609_v22, %v2082_v29  ;;  %v2153_v60 = vsel %vm2022_vm1, %v2115_v17, 0.0  ;;  %v2144_v30 = vsel %vm2022_vm1, %v2112_v40, 0.0 }
 0x235   : > { %2154 = vadd.xlane.f32.xlu0 %v2153_v60  ;;  %2145 = vadd.xlane.f32.xlu1 %v2144_v30  ;;  %v1271_v60 = vmul.f32 %v1255_v36, %v4631_v34  ;;  %v1272_v30 = vmul.f32 %v1256_v23, %v4633_v35  ;;  %v4775_v23 = vld [vmem:[%s5159_s10] ss:$0 sm:$0xff] }
 0x236   : > { %v2114_v37 = vmul.f32 %v4697_v44, %v4697_v44 }
 0x238   : > { %v2150_v50 = vsel %vm2022_vm1, %v2114_v37, 0.0  ;;  %v1287_v37 = vadd.f32 %v1271_v60, %v4735_v49 }
 0x239   : > { %2151 = vadd.xlane.f32.xlu0 %v2150_v50  ;;  %v2064_v47 = vpop.xlane.xlu1 %2063 }
 0x23a   : > { %v2085_v24 = vmul.f32 0.0625, %v2064_v47 }
 0x23c   : > { %v4705_v54 = vsub.f32 %v4613_v18, %v2085_v24  ;;  %v730_v24 = vld [vmem:[%s4534_s23 + $0xa] sm:$0x3] }
 0x23d   : > { %v2070_v56 = vpop.xlane.xlu0 %2069  ;;  %v2061_v22 = vpop.xlane.xlu1 %2060  ;;  %v1332_v35 = vrot.slane %v730_v24, %v4088_v2 }
 0x23e   : > { %v2087_v52 = vmul.f32 0.0625, %v2070_v56  ;;  %v2084_v59 = vmul.f32 0.0625, %v2061_v22  ;;  %v2117_v55 = vmul.f32 %v4705_v54, %v4705_v54  ;;  %v1288_v56 = vadd.f32 %v1272_v30, %v4739_v39 }
 0x240   : > { %v4710_v62 = vsub.f32 %v4619_v27, %v2087_v52  ;;  %v4713_v63 = vsub.f32 %v4615_v26, %v2084_v59  ;;  %v2159_v25 = vsel %vm2022_vm1, %v2117_v55, 0.0  ;;  %v4750_v52 = vld [vmem:[%s4521_s27 + $0x60] sm:$0xff]  ;;  %v777_v55 = vld [vmem:[%s4528_s19 + $0xd0] sm:$0xff] }
 0x241   : > { %v2067_v53 = vpop.xlane.xlu0 %2066  ;;  %2160 = vadd.xlane.f32.xlu1 %v2159_v25  ;;  %v4730_v11 = vpop.permute.xlu1 %1008  ;;  %v4754_v25 = vld [vmem:[%s4521_s27 + $0x68] sm:$0xff] }
 0x242   : > { %v2086_v18 = vmul.f32 0.0625, %v2067_v53  ;;  %v2119_v61 = vmul.f32 %v4710_v62, %v4710_v62  ;;  %v2116_v31 = vmul.f32 %v4713_v63, %v4713_v63  ;;  %v778_v53 = vld [vmem:[%s4528_s19 + $0xd8] sm:$0xff] }
 0x244   : > { %v4721_v43 = vsub.f32 %v4621_v6, %v2086_v18  ;;  %v2165_v27 = vsel %vm2022_vm1, %v2119_v61, 0.0  ;;  %v2156_v7 = vsel %vm2022_vm1, %v2116_v31, 0.0  ;;  %v1013_v6 = vrot.slane %v724_v58, %v4088_v2 }
 0x245   : > { %2166 = vadd.xlane.f32.xlu0 %v2165_v27  ;;  %2157 = vadd.xlane.f32.xlu1 %v2156_v7  ;;  %v4732_v13 = vpop.permute.xlu0 %1004  ;;  %v1303_v18 = vsub.f32 %v1287_v37, %v4735_v49 }
 0x246   : > { %v2118_v26 = vmul.f32 %v4721_v43, %v4721_v43 }
 0x248   : > { %v2162_v8 = vsel %vm2022_vm1, %v2118_v26, 0.0  ;;  %v1304_v26 = vsub.f32 %v1288_v56, %v4739_v39 }
 0x249   : > { %2163 = vadd.xlane.f32.xlu0 %v2162_v8 }
 0x256   : > { %1019 = vbcast.lane.b32.xlu1 %v1013_v6, 264 }
 0x25f   : > { %1015 = vbcast.lane.b32.xlu0 %v1013_v6, 256  ;;  %v4765_v6 = vld [vmem:[%s5158_s9] ss:$0 sm:$0xff] }
 0x29e   : > { %v2125_v3 = vpop.xlane.xlu1 %2124 }
 0x29f   : > { %v2169_v48 = vmul.f32 0.0625, %v2125_v3  ;;  %v1257_v3 = vsub.f32 %v777_v55, %v4750_v52 }
 0x2a1   : > { %v2185_v12 = vadd.f32 1e-05, %v2169_v48  ;;  %v1258_v48 = vsub.f32 %v778_v53, %v4754_v25 }
 0x2a2   : > { %v2131_v14 = vpop.xlane.xlu0 %2130 }
 0x2a3   : > { %v2171_v21 = vmul.f32 0.0625, %v2131_v14  ;;  %3836 = vrsqrt.f32 %v2185_v12 }
 0x2a5   : > { %v2187_v45 = vadd.f32 1e-05, %v2171_v21  ;;  %v1351_v21 = vmul.f32 %v1332_v35, %v1303_v18 }
 0x2a6   : > { %v2128_v16 = vpop.xlane.xlu0 %2127  ;;  %v2122_v51 = vpop.xlane.xlu1 %2121 }
 0x2a7   : > { %3838 = vrsqrt.f32 %v2187_v45  ;;  %v2170_v38 = vmul.f32 0.0625, %v2128_v16  ;;  %v2168_v29 = vmul.f32 0.0625, %v2122_v51  ;;  %v1352_v16 = vmul.f32 %v1332_v35, %v1304_v26 }
 0x2a9   : > { %v2186_v17 = vadd.f32 1e-05, %v2170_v38  ;;  %v2184_v40 = vadd.f32 1e-05, %v2168_v29  ;;  %v1273_v29 = vmul.f32 %v1257_v3, %v4732_v13  ;;  %v1367_v13 = vadd.f32 %v1351_v21, %v4735_v49 }
 0x2ab   : > { %3840 = vrsqrt.f32 %v2186_v17  ;;  %v1274_v17 = vmul.f32 %v1258_v48, %v4730_v11  ;;  %v1368_v11 = vadd.f32 %v1352_v16, %v4739_v39 }
 0x2ac   : > { %3842 = vrsqrt.f32 %v2184_v40 }
 0x2ad   : > { %v3837_v47 = vpop.eup %3836  ;;  %v1290_v24 = vadd.f32 %v1274_v17, %v4754_v25  ;;  %v3783_v39 = vpack.c.bf16 %v1368_v11, %v1367_v13 }
 0x2ae   : > { %v2137_v50 = vpop.xlane.xlu1 %2136  ;;  %v2217_v61 = vmul.f32 %v3837_v47, %v4635_v41  ;;  %v1289_v47 = vadd.f32 %v1273_v29, %v4750_v52 }
 0x2af   : > { %v2173_v22 = vmul.f32 0.0625, %v2137_v50 }
 0x2b0   : > { %v2239_v36 = vmul.f32 %v4765_v6, %v2217_v61 }
 0x2b1   : > { %v3839_v59 = vpop.eup %3838  ;;  %v2189_v34 = vadd.f32 1e-05, %v2173_v22 }
 0x2b2   : > { %v2219_v31 = vmul.f32 %v3839_v59, %v4639_v0  ;;  %v2143_v27 = vpop.xlane.xlu0 %2142  ;;  %v2134_v7 = vpop.xlane.xlu1 %2133  ;;  %v2261_v50 = vadd.f32 %v4775_v23, %v2239_v36  ;;  %v731_v59 = vld [vmem:[%s4534_s23 + $0xc] sm:$0x3] }
 0x2b3   : > { %3844 = vrsqrt.f32 %v2189_v34  ;;  %v2175_v8 = vmul.f32 0.0625, %v2143_v27  ;;  %v2172_v58 = vmul.f32 0.0625, %v2134_v7  ;;  %v1336_v61 = vrot.slane %v731_v59, %v4088_v2 }
 0x2b4   : > { %v2241_v0 = vmul.f32 %v4765_v6, %v2219_v31  ;;  %v2277_v18 = vmax.f32 %v2261_v50, 0.0  ;;  %v1305_v31 = vsub.f32 %v1289_v47, %v4750_v52  ;;  %v1306_v27 = vsub.f32 %v1290_v24, %v4754_v25  ;;  %v696_v47 = vld [vmem:[%s4521_s27 + $0x78] sm:$0xff] }
 0x2b5   : > { %v3841_v12 = vpop.eup %3840  ;;  %v2191_v41 = vadd.f32 1e-05, %v2175_v8  ;;  %v2188_v14 = vadd.f32 1e-05, %v2172_v58  ;;  %v780_v24 = vld [vmem:[%s4528_s19 + $0xf8] sm:$0xff] }
 0x2b6   : > { %v3843_v20 = vpop.eup %3842  ;;  %v2140_v15 = vpop.xlane.xlu0 %2139  ;;  %v2218_v45 = vmul.f32 %v3841_v12, %v4642_v46  ;;  %v2263_v30 = vadd.f32 %v4775_v23, %v2241_v0  ;;  %v1354_v0 = vmul.f32 %v1336_v61, %v1306_v27 }
 0x2b7   : > { %3846 = vrsqrt.f32 %v2191_v41  ;;  %v2174_v51 = vmul.f32 0.0625, %v2140_v15  ;;  %v2216_v38 = vmul.f32 %v3843_v20, %v4647_v57 }
 0x2b8   : > { %3848 = vrsqrt.f32 %v2188_v14  ;;  %v2240_v46 = vmul.f32 %v4765_v6, %v2218_v45  ;;  %v2279_v53 = vmax.f32 %v2263_v30, 0.0  ;;  %v1370_v29 = vadd.f32 %v1354_v0, %v4754_v25 }
 0x2b9   : > { %v2190_v40 = vadd.f32 1e-05, %v2174_v51  ;;  %v2238_v60 = vmul.f32 %v4765_v6, %v2216_v38 }
 0x2ba   : > { %v2262_v37 = vadd.f32 %v4775_v23, %v2240_v46 }
 0x2bb   : > { %3850 = vrsqrt.f32 %v2190_v40  ;;  %v2260_v57 = vadd.f32 %v4775_v23, %v2238_v60 }
 0x2bc   : > { %v2278_v56 = vmax.f32 %v2262_v37, 0.0 }
 0x2bd   : > { %v3845_v22 = vpop.eup %3844  ;;  %v2276_v55 = vmax.f32 %v2260_v57, 0.0 }
 0x2be   : > { %v2221_v34 = vmul.f32 %v3845_v22, %v4657_v1  ;;  %3654 = vmatprep.mubr.msk.f32.mxu1 %vm2022_vm1, %v2278_v56  ;;  %v2149_v35 = vpop.xlane.xlu1 %2148 }
 0x2bf   : > { %3647 = vmatprep.mubr.msk.f32.mxu0 %vm2022_vm1, %v2276_v55  ;;  %v2177_v49 = vmul.f32 0.0625, %v2149_v35  ;;  %3655 = vmatmul.mubr.msk.f32.vlgmr.msra.gmra.mrb[8].mxu1 %vm2022_vm1, %v2279_v53 }
 0x2c0   : > { %3648 = vmatmul.mubr.msk.f32.vlgmr.msra.gmra.mrb[8].mxu0 %vm2022_vm1, %v2277_v18  ;;  %3778 = vmatpush3.bf16.msra.mxu1 %v4564_v42  ;;  %v2243_v48 = vmul.f32 %v4765_v6, %v2221_v34  ;;  %v1353_v42 = vmul.f32 %v1336_v61, %v1305_v31  ;;  %v1260_v34 = vsub.f32 %v780_v24, %v696_v47  ;;  %v695_v61 = vld [vmem:[%s4521_s27 + $0x70] sm:$0xff] }
 0x2c1   : > { %v3847_v1 = vpop.eup %3846  ;;  %v2193_v7 = vadd.f32 1e-05, %v2177_v49  ;;  %3774 = vmatpush3.bf16.msra.mxu0 %v4560_v19  ;;  %3784 = vmatprep.subr.bf16.mxu1 %v3783_v39  ;;  %v779_v31 = vld [vmem:[%s4528_s19 + $0xf0] sm:$0xff]  ;;  %s3474_s19 = sshll.u32 %s4058_s29, 11  ;;  %s5108_s29 = scalar_lea.sflag [#allocation3], %s570_s6 }
 0x2c2   : > { %v3849_v26 = vpop.eup %3848  ;;  %v2223_v8 = vmul.f32 %v3847_v1, %v4662_v9  ;;  %3780 = vmatprep.subr.bf16.mxu0 %v4572_v4  ;;  %v2155_v58 = vpop.xlane.xlu0 %2154  ;;  %v2265_v36 = vadd.f32 %v4775_v23, %v2243_v48  ;;  %s5098_s20 = scalar_lea.hbm %s5162_s13, %s3474_s19 }
 0x2c3   : > { %v2146_v3 = vpop.xlane.xlu1 %2145  ;;  %3852 = vrsqrt.f32 %v2193_v7  ;;  %v2179_v12 = vmul.f32 0.0625, %v2155_v58  ;;  %v2220_v14 = vmul.f32 %v3849_v26, %v4665_v10  ;;  %v1369_v10 = vadd.f32 %v1353_v42, %v4750_v52  ;;  %v732_v26 = vld [vmem:[%s4534_s23 + $0xe] sm:$0x3] }
 0x2c4   : > { %v2176_v41 = vmul.f32 0.0625, %v2146_v3  ;;  %v2245_v9 = vmul.f32 %v4765_v6, %v2223_v8  ;;  %v2281_v30 = vmax.f32 %v2265_v36, 0.0  ;;  %v1259_v3 = vsub.f32 %v779_v31, %v695_v61 }
 0x2c5   : > { %v3851_v20 = vpop.eup %3850  ;;  %v2195_v21 = vadd.f32 1e-05, %v2179_v12  ;;  %v2242_v15 = vmul.f32 %v4765_v6, %v2220_v14  ;;  %v1340_v42 = vrot.slane %v732_v26, %v4088_v2 }
 0x2c6   : > { %v2192_v19 = vadd.f32 1e-05, %v2176_v41  ;;  %v2152_v45 = vpop.xlane.xlu0 %2151  ;;  %v2222_v16 = vmul.f32 %v3851_v20, %v4673_v33  ;;  %v2267_v60 = vadd.f32 %v4775_v23, %v2245_v9  ;;  %v3787_v33 = vpack.c.bf16 %v1370_v29, %v1369_v10 }
 0x2c7   : > { %3854 = vrsqrt.f32 %v2195_v21  ;;  %v2178_v51 = vmul.f32 0.0625, %v2152_v45  ;;  %v2264_v38 = vadd.f32 %v4775_v23, %v2242_v15 }
 0x2c8   : > { %3856 = vrsqrt.f32 %v2192_v19  ;;  %v2244_v17 = vmul.f32 %v4765_v6, %v2222_v16  ;;  %v2283_v25 = vmax.f32 %v2267_v60, 0.0 }
 0x2c9   : > { %v2194_v46 = vadd.f32 1e-05, %v2178_v51  ;;  %v2280_v40 = vmax.f32 %v2264_v38, 0.0 }
 0x2ca   : > { %v2266_v37 = vadd.f32 %v4775_v23, %v2244_v17 }
 0x2cb   : > { %3858 = vrsqrt.f32 %v2194_v46  ;;  %3661 = vmatprep.mubr.msk.f32.mxu0 %vm2022_vm1, %v2280_v40 }
 0x2cc   : > { %3662 = vmatmul.mubr.msk.f32.vlgmr.msra.gmra.mrb[10].mxu0 %vm2022_vm1, %v2281_v30  ;;  %v2282_v52 = vmax.f32 %v2266_v37, 0.0 }
 0x2cd   : > { %v3853_v50 = vpop.eup %3852  ;;  %3782 = vmatpush3.bf16.msra.mxu0 %v4572_v4 }
 0x2ce   : > { %v2225_v57 = vmul.f32 %v3853_v50, %v4681_v5  ;;  %3788 = vmatprep.subr.bf16.mxu0 %v3787_v33  ;;  %3668 = vmatprep.mubr.msk.f32.mxu1 %vm2022_vm1, %v2282_v52  ;;  %v2161_v13 = vpop.xlane.xlu1 %2160 }
 0x2cf   : > { %v2181_v11 = vmul.f32 0.0625, %v2161_v13  ;;  %3669 = vmatmul.mubr.msk.f32.vlgmr.msra.gmra.mrb[10].mxu1 %vm2022_vm1, %v2283_v25 }
 0x2d0   : > { %3786 = vmatpush3.bf16.msra.mxu1 %v3783_v39  ;;  %v2247_v53 = vmul.f32 %v4765_v6, %v2225_v57 }
 0x2d1   : > { %v3855_v56 = vpop.eup %3854  ;;  %v2197_v22 = vadd.f32 1e-05, %v2181_v11 }
 0x2d2   : > { %v3857_v59 = vpop.eup %3856  ;;  %v2227_v4 = vmul.f32 %v3855_v56, %v4686_v28  ;;  %v2167_v55 = vpop.xlane.xlu0 %2166  ;;  %v2269_v58 = vadd.f32 %v4775_v23, %v2247_v53 }
 0x2d3   : > { %v2158_v5 = vpop.xlane.xlu1 %2157  ;;  %3860 = vrsqrt.f32 %v2197_v22  ;;  %v2183_v35 = vmul.f32 0.0625, %v2167_v55  ;;  %v2224_v49 = vmul.f32 %v3857_v59, %v4689_v32 }
 0x2d4   : > { %v2180_v18 = vmul.f32 0.0625, %v2158_v5  ;;  %v2249_v28 = vmul.f32 %v4765_v6, %v2227_v4  ;;  %v2285_v9 = vmax.f32 %v2269_v58, 0.0 }
 0x2d5   : > { %v3859_v27 = vpop.eup %3858  ;;  %v2199_v39 = vadd.f32 1e-05, %v2183_v35  ;;  %v2246_v7 = vmul.f32 %v4765_v6, %v2224_v49 }
 0x2d6   : > { %v2196_v1 = vadd.f32 1e-05, %v2180_v18  ;;  %v2164_v8 = vpop.xlane.xlu0 %2163  ;;  %v2226_v12 = vmul.f32 %v3859_v27, %v4697_v44  ;;  %v2271_v15 = vadd.f32 %v4775_v23, %v2249_v28 }
 0x2d7   : > { %v1020_v48 = vpop.permute.xlu1 %1019  ;;  %3862 = vrsqrt.f32 %v2199_v39  ;;  %v2182_v41 = vmul.f32 0.0625, %v2164_v8  ;;  %v2268_v32 = vadd.f32 %v4775_v23, %v2246_v7 }
 0x2d8   : > { %v1276_v14 = vmul.f32 %v1260_v34, %v1020_v48  ;;  %3864 = vrsqrt.f32 %v2196_v1  ;;  %v2248_v0 = vmul.f32 %v4765_v6, %v2226_v12  ;;  %v2287_v29 = vmax.f32 %v2271_v15, 0.0 }
 0x2d9   : > { %v2198_v20 = vadd.f32 1e-05, %v2182_v41  ;;  %v2284_v21 = vmax.f32 %v2268_v32, 0.0 }
 0x2da   : > { %v1292_v19 = vadd.f32 %v1276_v14, %v696_v47  ;;  %v1016_v45 = vpop.permute.xlu0 %1015  ;;  %v2270_v36 = vadd.f32 %v4775_v23, %v2248_v0 }
 0x2db   : > { %3866 = vrsqrt.f32 %v2198_v20  ;;  %3675 = vmatprep.mubr.msk.f32.mxu0 %vm2022_vm1, %v2284_v21  ;;  %v1275_v44 = vmul.f32 %v1259_v3, %v1016_v45 }
 0x2dc   : > { %v1308_v16 = vsub.f32 %v1292_v19, %v696_v47  ;;  %3676 = vmatmul.mubr.msk.f32.vlgmr.msra.gmra.mrb[12].mxu0 %vm2022_vm1, %v2285_v9  ;;  %v2286_v51 = vmax.f32 %v2270_v36, 0.0 }
 0x2dd   : > { %v3861_v2 = vpop.eup %3860  ;;  %3790 = vmatpush3.bf16.msra.mxu0 %v3787_v33  ;;  %v1291_v38 = vadd.f32 %v1275_v44, %v695_v61 }
 0x2de   : > { %v1356_v10 = vmul.f32 %v1340_v42, %v1308_v16  ;;  %v2229_v17 = vmul.f32 %v3861_v2, %v4705_v54  ;;  %3682 = vmatprep.mubr.msk.f32.mxu1 %vm2022_vm1, %v2286_v51 }
 0x2df   : > { %v1307_v46 = vsub.f32 %v1291_v38, %v695_v61  ;;  %3683 = vmatmul.mubr.msk.f32.vlgmr.msra.gmra.mrb[12].mxu1 %vm2022_vm1, %v2287_v29 }
 0x2e0   : > { %v1372_v30 = vadd.f32 %v1356_v10, %v696_v47  ;;  %v2251_v50 = vmul.f32 %v4765_v6, %v2229_v17 }
 0x2e1   : > { %v3863_v40 = vpop.eup %3862  ;;  %v1355_v60 = vmul.f32 %v1340_v42, %v1307_v46 }
 0x2e2   : > { %v3865_v37 = vpop.eup %3864  ;;  %v2231_v52 = vmul.f32 %v3863_v40, %v4710_v62  ;;  %v2273_v24 = vadd.f32 %v4775_v23, %v2251_v50 }
 0x2e3   : > { %v1371_v25 = vadd.f32 %v1355_v60, %v695_v61  ;;  %v2228_v33 = vmul.f32 %v3865_v37, %v4713_v63 }
 0x2e4   : > { %v2253_v11 = vmul.f32 %v4765_v6, %v2231_v52  ;;  %v2289_v63 = vmax.f32 %v2273_v24, 0.0 }
 0x2e5   : > { %v3867_v57 = vpop.eup %3866  ;;  %v3791_v13 = vpack.c.bf16 %v1372_v30, %v1371_v25  ;;  %v2250_v54 = vmul.f32 %v4765_v6, %v2228_v33 }
 0x2e6   : > { %v2230_v56 = vmul.f32 %v3867_v57, %v4721_v43  ;;  %v2275_v59 = vadd.f32 %v4775_v23, %v2253_v11 }
 0x2e7   : > { %3792 = vmatprep.subr.bf16.mxu1 %v3791_v13  ;;  %v2272_v47 = vadd.f32 %v4775_v23, %v2250_v54 }
 0x2e8   : > { %3794 = vmatpush3.bf16.msra.mxu1 %v3791_v13  ;;  %v2252_v62 = vmul.f32 %v4765_v6, %v2230_v56  ;;  %v2291_v5 = vmax.f32 %v2275_v59, 0.0 }
 0x2e9   : > { %v2288_v22 = vmax.f32 %v2272_v47, 0.0 }
 0x2ea   : > { %v2274_v4 = vadd.f32 %v4775_v23, %v2252_v62 }
 0x2eb   : > { %3689 = vmatprep.mubr.msk.f32.mxu0 %vm2022_vm1, %v2288_v22 }
 0x2ec   : > { %3690 = vmatmul.mubr.msk.f32.vlgmr.msra.gmra.mrb[14].mxu0 %vm2022_vm1, %v2289_v63  ;;  %v2290_v55 = vmax.f32 %v2274_v4, 0.0 }
 0x2ee   : > { %3696 = vmatprep.mubr.msk.f32.mxu1 %vm2022_vm1, %v2290_v55 }
 0x2ef   : > { %3697 = vmatmul.mubr.msk.f32.vlgmr.msra.gmra.mrb[14].mxu1 %vm2022_vm1, %v2291_v5 }
 0x392   : > { %v3656_v43 = vpop.f32.mrb[8].mxu1 }
 0x393   : > { %v3649_v53 = vpop.f32.mrb[8].mxu0  ;;  %v2445_v34 = vpop.f32.mrb[9].mxu1  ;;  %v2949_v6 = vsel %vm1373_vm0, %v3656_v43, 0.0 }
 0x394   : > { %v2364_v35 = vpop.f32.mrb[9].mxu0  ;;  %2950 = vadd.xlane.f32.xlu0 %v2949_v6  ;;  %v2943_v18 = vsel %vm1373_vm0, %v3649_v53, 0.0  ;;  %v2946_v49 = vsel %vm1373_vm0, %v2445_v34, 0.0 }
 0x395   : > { %2944 = vadd.xlane.f32.xlu1 %v2943_v18  ;;  %v2940_v23 = vsel %vm1373_vm0, %v2364_v35, 0.0 }
 0x398   : > { %2941 = vadd.xlane.f32.xlu0 %v2940_v23 }
 0x39c   : > { %2947 = vadd.xlane.f32.xlu0 %v2946_v49 }
 0x39f   : > { %v4862_v61 = vpop.f32.mrb[10].mxu0 }
 0x3a0   : > { %v4864_v31 = vpop.f32.mrb[11].mxu0  ;;  %v2955_v27 = vsel %vm1373_vm0, %v4862_v61, 0.0 }
 0x3a1   : > { %2956 = vadd.xlane.f32.xlu0 %v2955_v27  ;;  %v2952_v39 = vsel %vm1373_vm0, %v4864_v31, 0.0 }
 0x3a2   : > { %2953 = vadd.xlane.f32.xlu1 %v2952_v39  ;;  %v4870_v1 = vpop.f32.mrb[10].mxu1 }
 0x3a3   : > { %v4872_v7 = vpop.f32.mrb[11].mxu1  ;;  %v2961_v26 = vsel %vm1373_vm0, %v4870_v1, 0.0 }
 0x3a4   : > { %v2958_v28 = vsel %vm1373_vm0, %v4872_v7, 0.0 }
 0x3a5   : > { %2962 = vadd.xlane.f32.xlu0 %v2961_v26 }
 0x3a6   : > { %2959 = vadd.xlane.f32.xlu1 %v2958_v28 }
 0x3af   : > { %v4878_v8 = vpop.f32.mrb[12].mxu0 }
 0x3b0   : > { %v4880_v58 = vpop.f32.mrb[13].mxu0  ;;  %v2967_v3 = vsel %vm1373_vm0, %v4878_v8, 0.0 }
 0x3b1   : > { %2968 = vadd.xlane.f32.xlu0 %v2967_v3  ;;  %v2964_v48 = vsel %vm1373_vm0, %v4880_v58, 0.0 }
 0x3b2   : > { %2965 = vadd.xlane.f32.xlu1 %v2964_v48  ;;  %v4886_v12 = vpop.f32.mrb[12].mxu1 }
 0x3b3   : > { %v4888_v41 = vpop.f32.mrb[13].mxu1  ;;  %v2973_v32 = vsel %vm1373_vm0, %v4886_v12, 0.0 }
 0x3b4   : > { %v2970_v14 = vsel %vm1373_vm0, %v4888_v41, 0.0 }
 0x3b5   : > { %2974 = vadd.xlane.f32.xlu0 %v2973_v32 }
 0x3b6   : > { %2971 = vadd.xlane.f32.xlu1 %v2970_v14 }
 0x3bf   : > { %v4894_v42 = vpop.f32.mrb[14].mxu0 }
 0x3c0   : > { %v4896_v0 = vpop.f32.mrb[15].mxu0  ;;  %v2979_v20 = vsel %vm1373_vm0, %v4894_v42, 0.0 }
 0x3c1   : > { %2980 = vadd.xlane.f32.xlu0 %v2979_v20  ;;  %v2976_v21 = vsel %vm1373_vm0, %v4896_v0, 0.0 }
 0x3c2   : > { %2977 = vadd.xlane.f32.xlu1 %v2976_v21  ;;  %v4902_v19 = vpop.f32.mrb[14].mxu1 }
 0x3c3   : > { %v4904_v15 = vpop.f32.mrb[15].mxu1  ;;  %v2985_v9 = vsel %vm1373_vm0, %v4902_v19, 0.0 }
 0x3c4   : > { %v2982_v45 = vsel %vm1373_vm0, %v4904_v15, 0.0 }
 0x3c5   : > { %2986 = vadd.xlane.f32.xlu0 %v2985_v9 }
 0x3c6   : > { %2983 = vadd.xlane.f32.xlu1 %v2982_v45 }
 0x421   : > { %v2951_v36 = vpop.xlane.xlu0 %2950 }
 0x422   : > { %v2992_v44 = vmul.f32 0.03125, %v2951_v36  ;;  %v2945_v16 = vpop.xlane.xlu1 %2944 }
 0x423   : > { %v2990_v51 = vmul.f32 0.03125, %v2945_v16 }
 0x424   : > { %v4910_v2 = vsub.f32 %v3656_v43, %v2992_v44 }
 0x425   : > { %v4912_v38 = vsub.f32 %v3649_v53, %v2990_v51  ;;  %v2942_v10 = vpop.xlane.xlu0 %2941 }
 0x426   : > { %v2989_v29 = vmul.f32 0.03125, %v2942_v10  ;;  %v3024_v30 = vmul.f32 %v4910_v2, %v4910_v2 }
 0x427   : > { %v3022_v17 = vmul.f32 %v4912_v38, %v4912_v38 }
 0x428   : > { %v4916_v46 = vsub.f32 %v2364_v35, %v2989_v29  ;;  %v3046_v33 = vsel %vm1373_vm0, %v3024_v30, 0.0 }
 0x429   : > { %v2948_v40 = vpop.xlane.xlu0 %2947  ;;  %v3040_v60 = vsel %vm1373_vm0, %v3022_v17, 0.0 }
 0x42a   : > { %v2991_v37 = vmul.f32 0.03125, %v2948_v40  ;;  %3041 = vadd.xlane.f32.xlu0 %v3040_v60  ;;  %v3021_v52 = vmul.f32 %v4916_v46, %v4916_v46 }
 0x42c   : > { %v4923_v50 = vsub.f32 %v2445_v34, %v2991_v37  ;;  %v3037_v25 = vsel %vm1373_vm0, %v3021_v52, 0.0 }
 0x42d   : > { %3038 = vadd.xlane.f32.xlu1 %v3037_v25 }
 0x42e   : > { %v2957_v57 = vpop.xlane.xlu0 %2956  ;;  %3047 = vadd.xlane.f32.xlu0 %v3046_v33  ;;  %v3023_v13 = vmul.f32 %v4923_v50, %v4923_v50 }
 0x42f   : > { %v2994_v54 = vmul.f32 0.03125, %v2957_v57  ;;  %v2954_v11 = vpop.xlane.xlu1 %2953 }
 0x430   : > { %v2993_v24 = vmul.f32 0.03125, %v2954_v11  ;;  %v3043_v56 = vsel %vm1373_vm0, %v3023_v13, 0.0 }
 0x431   : > { %v4931_v47 = vsub.f32 %v4862_v61, %v2994_v54  ;;  %3044 = vadd.xlane.f32.xlu1 %v3043_v56 }
 0x432   : > { %v4934_v62 = vsub.f32 %v4864_v31, %v2993_v24  ;;  %v2963_v22 = vpop.xlane.xlu0 %2962 }
 0x433   : > { %v2996_v59 = vmul.f32 0.03125, %v2963_v22  ;;  %v2960_v63 = vpop.xlane.xlu1 %2959  ;;  %v3026_v4 = vmul.f32 %v4931_v47, %v4931_v47 }
 0x434   : > { %v2995_v55 = vmul.f32 0.03125, %v2960_v63  ;;  %v3025_v5 = vmul.f32 %v4934_v62, %v4934_v62 }
 0x435   : > { %v4941_v43 = vsub.f32 %v4870_v1, %v2996_v59  ;;  %v3052_v53 = vsel %vm1373_vm0, %v3026_v4, 0.0 }
 0x436   : > { %v4945_v34 = vsub.f32 %v4872_v7, %v2995_v55  ;;  %3053 = vadd.xlane.f32.xlu0 %v3052_v53  ;;  %v3049_v6 = vsel %vm1373_vm0, %v3025_v5, 0.0 }
 0x437   : > { %3050 = vadd.xlane.f32.xlu1 %v3049_v6  ;;  %v3028_v35 = vmul.f32 %v4941_v43, %v4941_v43 }
 0x438   : > { %v3027_v18 = vmul.f32 %v4945_v34, %v4945_v34 }
 0x439   : > { %v3058_v23 = vsel %vm1373_vm0, %v3028_v35, 0.0 }
 0x43a   : > { %3059 = vadd.xlane.f32.xlu0 %v3058_v23  ;;  %v3055_v49 = vsel %vm1373_vm0, %v3027_v18, 0.0 }
 0x43b   : > { %3056 = vadd.xlane.f32.xlu1 %v3055_v49 }
 0x43e   : > { %v2969_v61 = vpop.xlane.xlu0 %2968 }
 0x43f   : > { %v2998_v31 = vmul.f32 0.03125, %v2969_v61  ;;  %v2966_v27 = vpop.xlane.xlu1 %2965 }
 0x440   : > { %v2997_v39 = vmul.f32 0.03125, %v2966_v27 }
 0x441   : > { %v4955_v1 = vsub.f32 %v4878_v8, %v2998_v31  ;;  %v5005_v31 = vld [vmem:[%s5160_s11] ss:$0 sm:$0xff] }
 0x442   : > { %v4958_v7 = vsub.f32 %v4880_v58, %v2997_v39  ;;  %v2975_v26 = vpop.xlane.xlu0 %2974 }
 0x443   : > { %v3000_v28 = vmul.f32 0.03125, %v2975_v26  ;;  %v2972_v3 = vpop.xlane.xlu1 %2971  ;;  %v3030_v48 = vmul.f32 %v4955_v1, %v4955_v1 }
 0x444   : > { %v2999_v32 = vmul.f32 0.03125, %v2972_v3  ;;  %v3029_v14 = vmul.f32 %v4958_v7, %v4958_v7  ;;  %v5012_v3 = vld [vmem:[%s5161_s12] ss:$0 sm:$0xff] }
 0x445   : > { %v4965_v20 = vsub.f32 %v4886_v12, %v3000_v28  ;;  %v3064_v21 = vsel %vm1373_vm0, %v3030_v48, 0.0 }
 0x446   : > { %v4969_v8 = vsub.f32 %v4888_v41, %v2999_v32  ;;  %3065 = vadd.xlane.f32.xlu0 %v3064_v21  ;;  %v3061_v58 = vsel %vm1373_vm0, %v3029_v14, 0.0 }
 0x447   : > { %3062 = vadd.xlane.f32.xlu1 %v3061_v58  ;;  %v3032_v9 = vmul.f32 %v4965_v20, %v4965_v20 }
 0x448   : > { %v3031_v45 = vmul.f32 %v4969_v8, %v4969_v8 }
 0x449   : > { %v3070_v36 = vsel %vm1373_vm0, %v3032_v9, 0.0 }
 0x44a   : > { %3071 = vadd.xlane.f32.xlu0 %v3070_v36  ;;  %v3067_v12 = vsel %vm1373_vm0, %v3031_v45, 0.0 }
 0x44b   : > { %3068 = vadd.xlane.f32.xlu1 %v3067_v12 }
 0x44e   : > { %v2981_v44 = vpop.xlane.xlu0 %2980 }
 0x44f   : > { %v3002_v16 = vmul.f32 0.03125, %v2981_v44  ;;  %v2978_v41 = vpop.xlane.xlu1 %2977 }
 0x450   : > { %v3001_v51 = vmul.f32 0.03125, %v2978_v41 }
 0x451   : > { %v4979_v10 = vsub.f32 %v4894_v42, %v3002_v16 }
 0x452   : > { %v4982_v29 = vsub.f32 %v4896_v0, %v3001_v51  ;;  %v2987_v17 = vpop.xlane.xlu0 %2986 }
 0x453   : > { %v3004_v40 = vmul.f32 0.03125, %v2987_v17  ;;  %v2984_v60 = vpop.xlane.xlu1 %2983  ;;  %v3034_v30 = vmul.f32 %v4979_v10, %v4979_v10 }
 0x454   : > { %v3003_v37 = vmul.f32 0.03125, %v2984_v60  ;;  %v3033_v52 = vmul.f32 %v4982_v29, %v4982_v29 }
 0x455   : > { %v4989_v25 = vsub.f32 %v4902_v19, %v3004_v40  ;;  %v3076_v33 = vsel %vm1373_vm0, %v3034_v30, 0.0 }
 0x456   : > { %v4993_v42 = vsub.f32 %v4904_v15, %v3003_v37  ;;  %3077 = vadd.xlane.f32.xlu0 %v3076_v33  ;;  %v3073_v0 = vsel %vm1373_vm0, %v3033_v52, 0.0 }
 0x457   : > { %3074 = vadd.xlane.f32.xlu1 %v3073_v0  ;;  %v3036_v57 = vmul.f32 %v4989_v25, %v4989_v25 }
 0x458   : > { %v3035_v13 = vmul.f32 %v4993_v42, %v4993_v42 }
 0x459   : > { %v3082_v54 = vsel %vm1373_vm0, %v3036_v57, 0.0 }
 0x45a   : > { %3083 = vadd.xlane.f32.xlu0 %v3082_v54  ;;  %v3079_v19 = vsel %vm1373_vm0, %v3035_v13, 0.0 }
 0x45b   : > { %3080 = vadd.xlane.f32.xlu1 %v3079_v19 }
 0x4b7   : > { %v3042_v11 = vpop.xlane.xlu0 %3041 }
 0x4b8   : > { %v3086_v24 = vmul.f32 0.03125, %v3042_v11 }
 0x4ba   : > { %v3102_v15 = vadd.f32 1e-05, %v3086_v24  ;;  %v3039_v56 = vpop.xlane.xlu1 %3038 }
 0x4bb   : > { %v3048_v22 = vpop.xlane.xlu0 %3047  ;;  %v3085_v59 = vmul.f32 0.03125, %v3039_v56 }
 0x4bc   : > { %3868 = vrsqrt.f32 %v3102_v15  ;;  %v3088_v63 = vmul.f32 0.03125, %v3048_v22 }
 0x4bd   : > { %v3101_v4 = vadd.f32 1e-05, %v3085_v59 }
 0x4be   : > { %v3104_v55 = vadd.f32 1e-05, %v3088_v63  ;;  %v3045_v5 = vpop.xlane.xlu1 %3044 }
 0x4bf   : > { %3870 = vrsqrt.f32 %v3101_v4  ;;  %v3087_v53 = vmul.f32 0.03125, %v3045_v5 }
 0x4c0   : > { %3872 = vrsqrt.f32 %v3104_v55 }
 0x4c1   : > { %v3103_v6 = vadd.f32 1e-05, %v3087_v53 }
 0x4c3   : > { %3874 = vrsqrt.f32 %v3103_v6  ;;  %v3054_v35 = vpop.xlane.xlu0 %3053 }
 0x4c4   : > { %v3090_v18 = vmul.f32 0.03125, %v3054_v35  ;;  %v3051_v23 = vpop.xlane.xlu1 %3050 }
 0x4c5   : > { %v3089_v49 = vmul.f32 0.03125, %v3051_v23 }
 0x4c6   : > { %v3869_v61 = vpop.eup %3868  ;;  %v3106_v27 = vadd.f32 1e-05, %v3090_v18 }
 0x4c7   : > { %v3134_v39 = vmul.f32 %v3869_v61, %v4912_v38  ;;  %v3105_v26 = vadd.f32 1e-05, %v3089_v49  ;;  %v3060_v28 = vpop.xlane.xlu0 %3059 }
 0x4c8   : > { %3876 = vrsqrt.f32 %v3106_v27  ;;  %v3092_v48 = vmul.f32 0.03125, %v3060_v28  ;;  %v3057_v32 = vpop.xlane.xlu1 %3056 }
 0x4c9   : > { %v3871_v14 = vpop.eup %3870  ;;  %v3156_v21 = vmul.f32 %v5005_v31, %v3134_v39  ;;  %3878 = vrsqrt.f32 %v3105_v26  ;;  %v3091_v58 = vmul.f32 0.03125, %v3057_v32 }
 0x4ca   : > { %v3873_v9 = vpop.eup %3872  ;;  %v3133_v38 = vmul.f32 %v3871_v14, %v4916_v46  ;;  %v3108_v45 = vadd.f32 1e-05, %v3092_v48 }
 0x4cb   : > { %v3178_v36 = vadd.f32 %v5012_v3, %v3156_v21  ;;  %v3136_v12 = vmul.f32 %v3873_v9, %v4910_v2  ;;  %v3107_v44 = vadd.f32 1e-05, %v3091_v58 }
 0x4cc   : > { %v3155_v16 = vmul.f32 %v5005_v31, %v3133_v38  ;;  %3880 = vrsqrt.f32 %v3108_v45 }
 0x4cd   : > { %v3875_v41 = vpop.eup %3874  ;;  %v3194_v51 = vmax.f32 %v3178_v36, 0.0  ;;  %v3158_v17 = vmul.f32 %v5005_v31, %v3136_v12  ;;  %3882 = vrsqrt.f32 %v3107_v44 }
 0x4ce   : > { %v3177_v40 = vadd.f32 %v5012_v3, %v3155_v16  ;;  %v3135_v60 = vmul.f32 %v3875_v41, %v4923_v50 }
 0x4cf   : > { %3210 = vst.msk [vmem:[%s5024_s17 + $0x8] sm:$0xff] %vm1373_vm0, %v3194_v51  ;;  %v3180_v2 = vadd.f32 %v5012_v3, %v3158_v17 }
 0x4d0   : > { %v3193_v46 = vmax.f32 %v3177_v40, 0.0  ;;  %v3157_v30 = vmul.f32 %v5005_v31, %v3135_v60 }
 0x4d1   : > { %v3196_v37 = vmax.f32 %v3180_v2, 0.0 }
 0x4d2   : > { %v3877_v52 = vpop.eup %3876  ;;  %3209 = vst.msk [vmem:[%s5024_s17] sm:$0xff] %vm1373_vm0, %v3193_v46  ;;  %v3179_v33 = vadd.f32 %v5012_v3, %v3157_v30 }
 0x4d3   : > { %v3879_v50 = vpop.eup %3878  ;;  %3212 = vst.msk [vmem:[%s5024_s17 + $0x18] sm:$0xff] %vm1373_vm0, %v3196_v37  ;;  %v3138_v0 = vmul.f32 %v3877_v52, %v4931_v47  ;;  %v3066_v57 = vpop.xlane.xlu0 %3065 }
 0x4d4   : > { %v3195_v13 = vmax.f32 %v3179_v33, 0.0  ;;  %v3137_v54 = vmul.f32 %v3879_v50, %v4934_v62  ;;  %v3094_v19 = vmul.f32 0.03125, %v3066_v57  ;;  %v3063_v11 = vpop.xlane.xlu1 %3062 }
 0x4d5   : > { %v3160_v24 = vmul.f32 %v5005_v31, %v3138_v0  ;;  %v3093_v15 = vmul.f32 0.03125, %v3063_v11 }
 0x4d6   : > { %v3881_v56 = vpop.eup %3880  ;;  %3211 = vst.msk [vmem:[%s5024_s17 + $0x10] sm:$0xff] %vm1373_vm0, %v3195_v13  ;;  %v3159_v22 = vmul.f32 %v5005_v31, %v3137_v54  ;;  %v3110_v59 = vadd.f32 1e-05, %v3094_v19 }
 0x4d7   : > { %v3883_v63 = vpop.eup %3882  ;;  %v3182_v4 = vadd.f32 %v5012_v3, %v3160_v24  ;;  %v3140_v47 = vmul.f32 %v3881_v56, %v4941_v43  ;;  %v3109_v55 = vadd.f32 1e-05, %v3093_v15  ;;  %v3072_v5 = vpop.xlane.xlu0 %3071 }
 0x4d8   : > { %v3181_v62 = vadd.f32 %v5012_v3, %v3159_v22  ;;  %v3139_v53 = vmul.f32 %v3883_v63, %v4945_v34  ;;  %3884 = vrsqrt.f32 %v3110_v59  ;;  %v3096_v6 = vmul.f32 0.03125, %v3072_v5  ;;  %v3069_v35 = vpop.xlane.xlu1 %3068 }
 0x4d9   : > { %v3198_v18 = vmax.f32 %v3182_v4, 0.0  ;;  %v3162_v23 = vmul.f32 %v5005_v31, %v3140_v47  ;;  %3886 = vrsqrt.f32 %v3109_v55  ;;  %v3095_v49 = vmul.f32 0.03125, %v3069_v35 }
 0x4da   : > { %v3197_v61 = vmax.f32 %v3181_v62, 0.0  ;;  %v3161_v43 = vmul.f32 %v5005_v31, %v3139_v53  ;;  %v3112_v27 = vadd.f32 1e-05, %v3096_v6 }
 0x4db   : > { %3214 = vst.msk [vmem:[%s5024_s17 + $0x28] sm:$0xff] %vm1373_vm0, %v3198_v18  ;;  %v3184_v39 = vadd.f32 %v5012_v3, %v3162_v23  ;;  %v3111_v26 = vadd.f32 1e-05, %v3095_v49 }
 0x4dc   : > { %3213 = vst.msk [vmem:[%s5024_s17 + $0x20] sm:$0xff] %vm1373_vm0, %v3197_v61  ;;  %v3183_v34 = vadd.f32 %v5012_v3, %v3161_v43  ;;  %3888 = vrsqrt.f32 %v3112_v27 }
 0x4dd   : > { %v3200_v28 = vmax.f32 %v3184_v39, 0.0  ;;  %3890 = vrsqrt.f32 %v3111_v26 }
 0x4de   : > { %v3199_v48 = vmax.f32 %v3183_v34, 0.0 }
 0x4df   : > { %3216 = vst.msk [vmem:[%s5024_s17 + $0x38] sm:$0xff] %vm1373_vm0, %v3200_v28 }
 0x4e0   : > { %3215 = vst.msk [vmem:[%s5024_s17 + $0x30] sm:$0xff] %vm1373_vm0, %v3199_v48 }
 0x4e2   : > { %v3885_v32 = vpop.eup %3884 }
 0x4e3   : > { %v3887_v14 = vpop.eup %3886  ;;  %v3142_v21 = vmul.f32 %v3885_v32, %v4955_v1  ;;  %v3078_v58 = vpop.xlane.xlu0 %3077 }
 0x4e4   : > { %v3141_v9 = vmul.f32 %v3887_v14, %v4958_v7  ;;  %v3098_v38 = vmul.f32 0.03125, %v3078_v58  ;;  %v3075_v45 = vpop.xlane.xlu1 %3074 }
 0x4e5   : > { %v3164_v36 = vmul.f32 %v5005_v31, %v3142_v21  ;;  %v3097_v12 = vmul.f32 0.03125, %v3075_v45 }
 0x4e6   : > { %v3889_v44 = vpop.eup %3888  ;;  %v3163_v16 = vmul.f32 %v5005_v31, %v3141_v9  ;;  %v3114_v41 = vadd.f32 1e-05, %v3098_v38 }
 0x4e7   : > { %v3891_v51 = vpop.eup %3890  ;;  %v3186_v17 = vadd.f32 %v5012_v3, %v3164_v36  ;;  %v3144_v40 = vmul.f32 %v3889_v44, %v4965_v20  ;;  %v3113_v60 = vadd.f32 1e-05, %v3097_v12  ;;  %v3084_v1 = vpop.xlane.xlu0 %3083 }
 0x4e8   : > { %v3185_v7 = vadd.f32 %v5012_v3, %v3163_v16  ;;  %v3143_v2 = vmul.f32 %v3891_v51, %v4969_v8  ;;  %3892 = vrsqrt.f32 %v3114_v41  ;;  %v3100_v46 = vmul.f32 0.03125, %v3084_v1  ;;  %v3081_v30 = vpop.xlane.xlu1 %3080 }
 0x4e9   : > { %v3202_v37 = vmax.f32 %v3186_v17, 0.0  ;;  %v3166_v52 = vmul.f32 %v5005_v31, %v3144_v40  ;;  %3894 = vrsqrt.f32 %v3113_v60  ;;  %v3099_v33 = vmul.f32 0.03125, %v3081_v30 }
 0x4ea   : > { %v3201_v50 = vmax.f32 %v3185_v7, 0.0  ;;  %v3165_v20 = vmul.f32 %v5005_v31, %v3143_v2  ;;  %v3116_v0 = vadd.f32 1e-05, %v3100_v46 }
 0x4eb   : > { %3218 = vst.msk [vmem:[%s5024_s17 + $0x48] sm:$0xff] %vm1373_vm0, %v3202_v37  ;;  %v3188_v57 = vadd.f32 %v5012_v3, %v3166_v52  ;;  %v3115_v13 = vadd.f32 1e-05, %v3099_v33 }
 0x4ec   : > { %3217 = vst.msk [vmem:[%s5024_s17 + $0x40] sm:$0xff] %vm1373_vm0, %v3201_v50  ;;  %v3187_v8 = vadd.f32 %v5012_v3, %v3165_v20  ;;  %3896 = vrsqrt.f32 %v3116_v0 }
 0x4ed   : > { %v3204_v54 = vmax.f32 %v3188_v57, 0.0  ;;  %3898 = vrsqrt.f32 %v3115_v13 }
 0x4ee   : > { %v3203_v19 = vmax.f32 %v3187_v8, 0.0 }
 0x4ef   : > { %3220 = vst.msk [vmem:[%s5024_s17 + $0x58] sm:$0xff] %vm1373_vm0, %v3204_v54 }
 0x4f0   : > { %3219 = vst.msk [vmem:[%s5024_s17 + $0x50] sm:$0xff] %vm1373_vm0, %v3203_v19 }
 0x4f2   : > { %v3893_v11 = vpop.eup %3892 }
 0x4f3   : > { %v3895_v24 = vpop.eup %3894  ;;  %v3146_v15 = vmul.f32 %v3893_v11, %v4979_v10 }
 0x4f4   : > { %v3145_v56 = vmul.f32 %v3895_v24, %v4982_v29 }
 0x4f5   : > { %v3168_v22 = vmul.f32 %v5005_v31, %v3146_v15 }
 0x4f6   : > { %v3897_v59 = vpop.eup %3896  ;;  %v3167_v63 = vmul.f32 %v5005_v31, %v3145_v56 }
 0x4f7   : > { %v3899_v4 = vpop.eup %3898  ;;  %v3190_v47 = vadd.f32 %v5012_v3, %v3168_v22  ;;  %v3148_v55 = vmul.f32 %v3897_v59, %v4989_v25 }
 0x4f8   : > { %v3189_v5 = vadd.f32 %v5012_v3, %v3167_v63  ;;  %v3147_v62 = vmul.f32 %v3899_v4, %v4993_v42 }
 0x4f9   : > { %v3206_v10 = vmax.f32 %v3190_v47, 0.0  ;;  %v3170_v29 = vmul.f32 %v5005_v31, %v3148_v55 }
 0x4fa   : > { %v3205_v53 = vmax.f32 %v3189_v5, 0.0  ;;  %v3169_v6 = vmul.f32 %v5005_v31, %v3147_v62 }
 0x4fb   : > { %3222 = vst.msk [vmem:[%s5024_s17 + $0x68] sm:$0xff] %vm1373_vm0, %v3206_v10  ;;  %v3192_v25 = vadd.f32 %v5012_v3, %v3170_v29 }
 0x4fc   : > { %3221 = vst.msk [vmem:[%s5024_s17 + $0x60] sm:$0xff] %vm1373_vm0, %v3205_v53  ;;  %v3191_v35 = vadd.f32 %v5012_v3, %v3169_v6 }
 0x4fd   : > { %v3208_v42 = vmax.f32 %v3192_v25, 0.0 }
 0x4fe   : > { %v3207_v31 = vmax.f32 %v3191_v35, 0.0 }
 0x4ff   : > { %3224 = vst.msk [vmem:[%s5024_s17 + $0x78] sm:$0xff] %vm1373_vm0, %v3208_v42 }
 0x500   : > { %3223 = vst.msk [vmem:[%s5024_s17 + $0x70] sm:$0xff] %vm1373_vm0, %v3207_v31 }
 0x501   : > { %3913 = shalt.err (!%p3910_p3)
}
 0x502   : > { %s3914_s0 = scalar_lea.hbm %s5098_s20, 2048  ;;  %s3918_s27 = scalar_lea.hbm %s5162_s13, 4096 }
 0x503   : > { %p3915_p4 = scmp.ne.s32.totalorder %s5098_s20, %s3914_s0  ;;  %p3919_p9 = scmp.lt.u32.totalorder %s5098_s20, %s5162_s13 }
 0x504   : > { %p3920_p10 = scmp.lt.u32.totalorder %s3918_s27, %s3914_s0  ;;  %p3922_p12 = scmp.lt.u32.totalorder %s3914_s0, %s5098_s20 }
 0x505   : > { %p3916_p7 = pnand %p3915_p4, %p4075_p5 }
 0x506   : > { %p3921_p11 = por %p3920_p10, %p3919_p9 }
 0x507   : > { %p3917_p8 = pneg %p3916_p7 }
 0x508   : > { %p3923_p13 = por %p3922_p12, %p3921_p11 }
 0x50a   : > { %p3924_p0 = pnand %p3923_p13, %p3917_p8 }
 0x50c   : > { %3927 = shalt.err (!%p3924_p0)
}
 0x50d   : > { %s3965_s19 = smov 128   ;;  %s3966_s22 = smov 8  }
 0x50e   : > { %3795 = dma.vmem_to_hbm [thread:$0]  (%p4075_p5), %s5100_s30, 2048, %s5098_s20, %s5108_s29, %s3965_s19, %s3965_s19, %s3966_s22  }
 0x50f PF: > { %p3801_p1 = scmp.ge.s32.totalorder %s3962_s28, 2  ;;  %s3255_s21 = sand.u32 1, %s3950_s25  }
 0x510   : > { %s3256_s16 = scalar_lea.sflag [#allocation3], %s3255_s21 }
 0x511   : > { %p3798_p2 = pnand %p3801_p1, %p4079_p6 }
 0x513   : > { %3945 = dma.done.wait (!%p3798_p2), %s3256_s16, 2048  }
 0x514   : > { %3947 = vsyncadd (!%p3798_p2), %s3256_s16, 4294965248  ;;  %s5182_s28 = sld [smem:[#allocation6_spill]]  ;;  %s5183_s24 = sld [smem:[#allocation5_spill]] }
 0x515   : > { %s5184_s27 = sld [smem:[#allocation7_spill]]  ;;  %s5185_s25 = smov %s3954_s26 }
 0x51a   : > { %p23_p3 = scmp.ge.s32.totalorder %s5182_s28, 4   ;;  %s5186_s26 = smov %s5183_s24 }
 0x51c   :  { %25 = sbr.rel (!%p23_p3) target bundleno = 7 (0x7), region = 131 }
 0x523   :  { %3261 = vsyncpa [#allocation3], 1 }
 0x524   :  { %3263 = vsyncpa [#allocation3 + $0x1], 1 }

</bundles_post_ra>
